<compile_context>
chip_gen: v7x
topology: tpu7x:2x2x1
jax: 0.10.0
libtpu: 0.0.40
codegen_flags: <defaults>
</compile_context>

<pallas_src>
import jax
import jax.numpy as jnp
import numpy as np
from jax.experimental import pallas as pl
from jax.experimental.pallas import tpu as pltpu


def _make_kernel(T, Bp, H):
    """Single-invocation LSTM(2-layer) + LayerNorm + ReLU + FC kernel body."""
    H4 = 4 * H

    def kernel(x_ref, wih0_ref, b0_ref, wfused_ref, whh1_ref, b1_ref,
               lnw_ref, lnb_ref, fcw_ref, fcb_ref, out_ref):
        # ---- hoisted layer-0 input projection: one (T*Bp, D) @ (D, 4H)
        # matmul + combined (and g-prescaled) bias, done before the recurrence.
        xproj = (jnp.dot(x_ref[...], wih0_ref[...],
                         preferred_element_type=jnp.float32)
                 + b0_ref[...])                                # (T*Bp, 4H)

        wfused = wfused_ref[...]                               # (H, 8H)
        whh1 = whh1_ref[...]                                   # (H, 4H)
        b1 = jnp.broadcast_to(b1_ref[...], (Bp, H4))           # hoisted bcast

        h0 = jnp.zeros((Bp, H), jnp.float32)
        c0 = jnp.zeros((Bp, H), jnp.float32)
        h1 = jnp.zeros((Bp, H), jnp.float32)
        c1 = jnp.zeros((Bp, H), jnp.float32)
        rec0 = jnp.zeros((Bp, H4), jnp.float32)   # h0_{-1} @ whh0 == 0

        def gate_act(gates):
            # Single full-width EUP push.  g columns were pre-scaled by 2 in
            # the weights/biases, so tanh(g_raw) == 2*sigmoid(2*g_raw) - 1.
            sig = jax.nn.sigmoid(gates)
            i = sig[:, 0 * H:1 * H]
            f = sig[:, 1 * H:2 * H]
            g = 2.0 * sig[:, 2 * H:3 * H] - 1.0
            o = sig[:, 3 * H:4 * H]
            return i, f, g, o

        # ---- fully unrolled static time loop
        for t in range(T):
            # Off the h0 critical chain: depends only on h1_{t-1}; the
            # scheduler can overlap this MXU push with layer-0 gate math.
            rec1 = jnp.dot(h1, whh1, preferred_element_type=jnp.float32)

            # Layer 0 (input part precomputed in xproj; recurrent part rec0
            # was produced by the previous step's fused matmul).
            gates0 = xproj[t * Bp:(t + 1) * Bp, :] + rec0
            i0, f0, g0, o0 = gate_act(gates0)
            c0 = f0 * c0 + i0 * g0
            h0 = o0 * jnp.tanh(c0)

            # The ONLY dependent matmul per step on the h0 chain:
            #   fused[:, :4H] = h0_t @ wih1  (layer-1 input term for step t)
            #   fused[:, 4H:] = h0_t @ whh0  (layer-0 recurrent term, step t+1)
            fused = jnp.dot(h0, wfused, preferred_element_type=jnp.float32)
            rec0 = fused[:, H4:]

            # Layer 1.
            gates1 = fused[:, :H4] + rec1 + b1
            i1, f1, g1, o1 = gate_act(gates1)
            c1 = f1 * c1 + i1 * g1
            h1 = o1 * jnp.tanh(c1)

        # ---- LayerNorm (biased variance, eps=1e-5) + ReLU + FC on the last
        # timestep's top-layer hidden state.
        mu = jnp.mean(h1, axis=-1, keepdims=True)
        var = jnp.mean((h1 - mu) ** 2, axis=-1, keepdims=True)
        y = (h1 - mu) * jax.lax.rsqrt(var + 1e-5)
        y = y * lnw_ref[...] + lnb_ref[...]
        y = jnp.maximum(y, 0.0)
        out_ref[...] = (jnp.dot(y, fcw_ref[...],
                                preferred_element_type=jnp.float32)
                        + fcb_ref[...])

    return kernel


def pack_kernel_params(params):
    """One-time packing: fuse wih1|whh0, pre-scale g-gate columns by 2.

    Run once outside the forward; the jitted wrapper does no weight math.
    """
    H = params["whh0_t"].shape[0]

    def scale_g(w):   # scale the g-gate block (columns [2H:3H]) by 2
        return w.at[..., 2 * H:3 * H].multiply(2.0)

    wih1_s = scale_g(params["wih1_t"])          # (H, 4H)
    whh0_s = scale_g(params["whh0_t"])          # (H, 4H)
    return {
        "wih0_t": scale_g(params["wih0_t"]),    # (D, 4H)
        "b0": scale_g(params["b0"]),            # (1, 4H)
        "w_fused": jnp.concatenate([wih1_s, whh0_s], axis=1),   # (H, 8H)
        "whh1_t": scale_g(params["whh1_t"]),    # (H, 4H)
        "b1": scale_g(params["b1"]),            # (1, 4H)
        "ln_w": params["ln_w"], "ln_b": params["ln_b"],
        "fcw_t": params["fcw_t"], "fcb": params["fcb"],
    }


@jax.jit
def eye_state_double_lstm_32(x, kparams):
    """x: (B, T, D_in) float32 (batch_first, like PyTorch). Returns (B, C)."""
    B, T, D = x.shape
    H = kparams["whh1_t"].shape[0]
    C = kparams["fcw_t"].shape[1]
    Bp = ((B + 7) // 8) * 8                     # pad batch to a full sublane tile

    # Zero-pad batch, go seq-major, flatten time: (T*Bp, D).  Layout plumbing
    # only; fused by XLA with the pallas_call dispatch under jit.
    xp = jnp.pad(x, ((0, Bp - B), (0, 0), (0, 0)))
    x2d = jnp.transpose(xp, (1, 0, 2)).reshape(T * Bp, D)

    kernel = _make_kernel(T, Bp, H)

    inputs = (x2d, kparams["wih0_t"], kparams["b0"], kparams["w_fused"],
              kparams["whh1_t"], kparams["b1"],
              kparams["ln_w"], kparams["ln_b"],
              kparams["fcw_t"], kparams["fcb"])

    vmem_spec = pl.BlockSpec(memory_space=pltpu.MemorySpace.VMEM)
    out = pl.pallas_call(
        kernel,
        out_shape=jax.ShapeDtypeStruct((Bp, C), jnp.float32),
        in_specs=[vmem_spec] * len(inputs),
        out_specs=vmem_spec,
    )(*inputs)
    return out[:B]


def init_params(key, input_size, hidden_size, num_classes):
    """Deterministic synthetic params. H = hidden_size - 96 (PyTorch module)."""
    H = hidden_size - 96
    k = jax.random.split(key, 12)
    s = 1.0 / np.sqrt(H)
    u = lambda kk, shape: jax.random.uniform(kk, shape, jnp.float32, -s, s)

    # PyTorch stores W_ih: (4H, in), W_hh: (4H, H); we pre-transpose.
    wih0 = u(k[0], (4 * H, input_size))
    whh0 = u(k[1], (4 * H, H))
    bih0 = u(k[2], (4 * H,))
    bhh0 = u(k[3], (4 * H,))
    wih1 = u(k[4], (4 * H, H))
    whh1 = u(k[5], (4 * H, H))
    bih1 = u(k[6], (4 * H,))
    bhh1 = u(k[7], (4 * H,))
    ln_w = u(k[8], (H,))
    ln_b = u(k[9], (H,))
    fcw = u(k[10], (num_classes, H))
    fcb = u(k[11], (num_classes,))

    return {
        "wih0_t": wih0.T, "whh0_t": whh0.T, "b0": (bih0 + bhh0)[None, :],
        "wih1_t": wih1.T, "whh1_t": whh1.T, "b1": (bih1 + bhh1)[None, :],
        "ln_w": ln_w[None, :], "ln_b": ln_b[None, :],
        "fcw_t": fcw.T, "fcb": fcb[None, :],
    }


def reference_forward(x, params):
    """Pure-JAX reference identical to the PyTorch forward (unscaled weights)."""
    B, T, D = x.shape
    H = params["whh0_t"].shape[0]

    def cell(inp, h, c, wih_t, whh_t, b):
        g = inp @ wih_t + h @ whh_t + b
        i = jax.nn.sigmoid(g[:, 0 * H:1 * H])
        f = jax.nn.sigmoid(g[:, 1 * H:2 * H])
        gg = jnp.tanh(g[:, 2 * H:3 * H])
        o = jax.nn.sigmoid(g[:, 3 * H:4 * H])
        c = f * c + i * gg
        return o * jnp.tanh(c), c

    h0 = c0 = h1 = c1 = jnp.zeros((B, H), jnp.float32)
    for t in range(T):
        h0, c0 = cell(x[:, t, :], h0, c0,
                      params["wih0_t"], params["whh0_t"], params["b0"])
        h1, c1 = cell(h0, h1, c1,
                      params["wih1_t"], params["whh1_t"], params["b1"])
    mu = jnp.mean(h1, axis=-1, keepdims=True)
    var = jnp.mean((h1 - mu) ** 2, axis=-1, keepdims=True)
    y = (h1 - mu) / jnp.sqrt(var + 1e-5) * params["ln_w"] + params["ln_b"]
    y = jnp.maximum(y, 0.0)
    return y @ params["fcw_t"] + params["fcb"]


if __name__ == "__main__":
    key = jax.random.PRNGKey(0)
    k_x, k_p = jax.random.split(key)

    # Small shapes consistent with the module: hidden_size=128 -> H=32.
    B, T, D_in = 2, 8, 4
    hidden_size, num_classes = 128, 2

    x = jax.random.normal(k_x, (B, T, D_in), jnp.float32)
    params = init_params(k_p, D_in, hidden_size, num_classes)
    kparams = pack_kernel_params(params)       # one-time weight packing

    out = eye_state_double_lstm_32(x, kparams)
    out = jax.block_until_ready(out)

    ref = reference_forward(x, params)
    np.testing.assert_allclose(np.asarray(out), np.asarray(ref),
                               rtol=1e-4, atol=1e-4)
    print("KERNEL_OK")
</pallas_src>

<mosaic_0001>
module attributes {stable_mosaic.version = 11 : i64} {
  func.func @kernel(%arg0: memref<64x4xf32, #tpu.memory_space<vmem>>, %arg1: memref<4x128xf32, #tpu.memory_space<vmem>>, %arg2: memref<1x128xf32, #tpu.memory_space<vmem>>, %arg3: memref<32x256xf32, #tpu.memory_space<vmem>>, %arg4: memref<32x128xf32, #tpu.memory_space<vmem>>, %arg5: memref<1x128xf32, #tpu.memory_space<vmem>>, %arg6: memref<1x32xf32, #tpu.memory_space<vmem>>, %arg7: memref<1x32xf32, #tpu.memory_space<vmem>>, %arg8: memref<32x2xf32, #tpu.memory_space<vmem>>, %arg9: memref<1x2xf32, #tpu.memory_space<vmem>>, %arg10: memref<8x2xf32, #tpu.memory_space<vmem>>) attributes {dimension_semantics = [], scalar_prefetch = 0 : i64, scratch_operands = 0 : i64, tpu.core_type = #tpu.core_type<tc>} {
    %c0 = arith.constant 0 : index
    %c0_0 = arith.constant 0 : index
    %0 = vector.load %arg0[%c0, %c0_0] : memref<64x4xf32, #tpu.memory_space<vmem>>, vector<64x4xf32>
    %c0_1 = arith.constant 0 : index
    %c0_2 = arith.constant 0 : index
    %1 = vector.load %arg1[%c0_1, %c0_2] : memref<4x128xf32, #tpu.memory_space<vmem>>, vector<4x128xf32>
    %cst = arith.constant dense<0.000000e+00> : vector<64x128xf32>
    %2 = tpu.matmul %0, %1, %cst {dimension_numbers = #tpu.dot_dimension_numbers<[1], [0], [0], [1], [0, 0, 1, 1], [], []>} : vector<64x4xf32>, vector<4x128xf32>, vector<64x128xf32> -> vector<64x128xf32>
    %c0_3 = arith.constant 0 : index
    %c0_4 = arith.constant 0 : index
    %3 = vector.load %arg2[%c0_3, %c0_4] : memref<1x128xf32, #tpu.memory_space<vmem>>, vector<1x128xf32>
    %4 = vector.broadcast %3 : vector<1x128xf32> to vector<64x128xf32>
    %5 = arith.addf %2, %4 : vector<64x128xf32>
    %c0_5 = arith.constant 0 : index
    %c0_6 = arith.constant 0 : index
    %6 = vector.load %arg3[%c0_5, %c0_6] : memref<32x256xf32, #tpu.memory_space<vmem>>, vector<32x256xf32>
    %c0_7 = arith.constant 0 : index
    %c0_8 = arith.constant 0 : index
    %7 = vector.load %arg4[%c0_7, %c0_8] : memref<32x128xf32, #tpu.memory_space<vmem>>, vector<32x128xf32>
    %c0_9 = arith.constant 0 : index
    %c0_10 = arith.constant 0 : index
    %8 = vector.load %arg5[%c0_9, %c0_10] : memref<1x128xf32, #tpu.memory_space<vmem>>, vector<1x128xf32>
    %9 = vector.shape_cast %8 : vector<1x128xf32> to vector<1x128xf32>
    %10 = vector.broadcast %9 : vector<1x128xf32> to vector<8x128xf32>
    %cst_11 = arith.constant 0.000000e+00 : f32
    %11 = vector.broadcast %cst_11 : f32 to vector<8x32xf32>
    %cst_12 = arith.constant 0.000000e+00 : f32
    %12 = vector.broadcast %cst_12 : f32 to vector<8x32xf32>
    %cst_13 = arith.constant 0.000000e+00 : f32
    %13 = vector.broadcast %cst_13 : f32 to vector<8x32xf32>
    %cst_14 = arith.constant 0.000000e+00 : f32
    %14 = vector.broadcast %cst_14 : f32 to vector<8x128xf32>
    %cst_15 = arith.constant dense<0.000000e+00> : vector<8x128xf32>
    %15 = tpu.matmul %12, %7, %cst_15 {dimension_numbers = #tpu.dot_dimension_numbers<[1], [0], [0], [1], [0, 0, 1, 1], [], []>} : vector<8x32xf32>, vector<32x128xf32>, vector<8x128xf32> -> vector<8x128xf32>
    %16 = vector.extract_strided_slice %5 {offsets = [0, 0], sizes = [8, 128], strides = [1, 1]} : vector<64x128xf32> to vector<8x128xf32>
    %17 = arith.addf %16, %14 : vector<8x128xf32>
    %18 = arith.negf %17 : vector<8x128xf32>
    %19 = math.exp %18 : vector<8x128xf32>
    %cst_16 = arith.constant 1.000000e+00 : f32
    %20 = vector.broadcast %cst_16 : f32 to vector<8x128xf32>
    %21 = arith.addf %20, %19 : vector<8x128xf32>
    %22 = arith.divf %20, %21 : vector<8x128xf32>
    %23 = vector.extract_strided_slice %22 {offsets = [0, 0], sizes = [8, 32], strides = [1, 1]} : vector<8x128xf32> to vector<8x32xf32>
    %24 = vector.extract_strided_slice %22 {offsets = [0, 32], sizes = [8, 32], strides = [1, 1]} : vector<8x128xf32> to vector<8x32xf32>
    %25 = vector.extract_strided_slice %22 {offsets = [0, 64], sizes = [8, 32], strides = [1, 1]} : vector<8x128xf32> to vector<8x32xf32>
    %cst_17 = arith.constant 2.000000e+00 : f32
    %26 = vector.broadcast %cst_17 : f32 to vector<8x32xf32>
    %27 = arith.mulf %26, %25 : vector<8x32xf32>
    %cst_18 = arith.constant 1.000000e+00 : f32
    %28 = vector.broadcast %cst_18 : f32 to vector<8x32xf32>
    %29 = arith.subf %27, %28 : vector<8x32xf32>
    %30 = vector.extract_strided_slice %22 {offsets = [0, 96], sizes = [8, 32], strides = [1, 1]} : vector<8x128xf32> to vector<8x32xf32>
    %31 = arith.mulf %24, %11 : vector<8x32xf32>
    %32 = arith.mulf %23, %29 : vector<8x32xf32>
    %33 = arith.addf %31, %32 : vector<8x32xf32>
    %34 = math.tanh %33 : vector<8x32xf32>
    %35 = arith.mulf %30, %34 : vector<8x32xf32>
    %cst_19 = arith.constant dense<0.000000e+00> : vector<8x256xf32>
    %36 = tpu.matmul %35, %6, %cst_19 {dimension_numbers = #tpu.dot_dimension_numbers<[1], [0], [0], [1], [0, 0, 1, 1], [], []>} : vector<8x32xf32>, vector<32x256xf32>, vector<8x256xf32> -> vector<8x256xf32>
    %37 = vector.extract_strided_slice %36 {offsets = [0, 128], sizes = [8, 128], strides = [1, 1]} : vector<8x256xf32> to vector<8x128xf32>
    %38 = vector.extract_strided_slice %36 {offsets = [0, 0], sizes = [8, 128], strides = [1, 1]} : vector<8x256xf32> to vector<8x128xf32>
    %39 = arith.addf %38, %15 : vector<8x128xf32>
    %40 = arith.addf %39, %10 : vector<8x128xf32>
    %41 = arith.negf %40 : vector<8x128xf32>
    %42 = math.exp %41 : vector<8x128xf32>
    %cst_20 = arith.constant 1.000000e+00 : f32
    %43 = vector.broadcast %cst_20 : f32 to vector<8x128xf32>
    %44 = arith.addf %43, %42 : vector<8x128xf32>
    %45 = arith.divf %43, %44 : vector<8x128xf32>
    %46 = vector.extract_strided_slice %45 {offsets = [0, 0], sizes = [8, 32], strides = [1, 1]} : vector<8x128xf32> to vector<8x32xf32>
    %47 = vector.extract_strided_slice %45 {offsets = [0, 32], sizes = [8, 32], strides = [1, 1]} : vector<8x128xf32> to vector<8x32xf32>
    %48 = vector.extract_strided_slice %45 {offsets = [0, 64], sizes = [8, 32], strides = [1, 1]} : vector<8x128xf32> to vector<8x32xf32>
    %cst_21 = arith.constant 2.000000e+00 : f32
    %49 = vector.broadcast %cst_21 : f32 to vector<8x32xf32>
    %50 = arith.mulf %49, %48 : vector<8x32xf32>
    %cst_22 = arith.constant 1.000000e+00 : f32
    %51 = vector.broadcast %cst_22 : f32 to vector<8x32xf32>
    %52 = arith.subf %50, %51 : vector<8x32xf32>
    %53 = vector.extract_strided_slice %45 {offsets = [0, 96], sizes = [8, 32], strides = [1, 1]} : vector<8x128xf32> to vector<8x32xf32>
    %54 = arith.mulf %47, %13 : vector<8x32xf32>
    %55 = arith.mulf %46, %52 : vector<8x32xf32>
    %56 = arith.addf %54, %55 : vector<8x32xf32>
    %57 = math.tanh %56 : vector<8x32xf32>
    %58 = arith.mulf %53, %57 : vector<8x32xf32>
    %cst_23 = arith.constant dense<0.000000e+00> : vector<8x128xf32>
    %59 = tpu.matmul %58, %7, %cst_23 {dimension_numbers = #tpu.dot_dimension_numbers<[1], [0], [0], [1], [0, 0, 1, 1], [], []>} : vector<8x32xf32>, vector<32x128xf32>, vector<8x128xf32> -> vector<8x128xf32>
    %60 = vector.extract_strided_slice %5 {offsets = [8, 0], sizes = [8, 128], strides = [1, 1]} : vector<64x128xf32> to vector<8x128xf32>
    %61 = arith.addf %60, %37 : vector<8x128xf32>
    %62 = arith.negf %61 : vector<8x128xf32>
    %63 = math.exp %62 : vector<8x128xf32>
    %cst_24 = arith.constant 1.000000e+00 : f32
    %64 = vector.broadcast %cst_24 : f32 to vector<8x128xf32>
    %65 = arith.addf %64, %63 : vector<8x128xf32>
    %66 = arith.divf %64, %65 : vector<8x128xf32>
    %67 = vector.extract_strided_slice %66 {offsets = [0, 0], sizes = [8, 32], strides = [1, 1]} : vector<8x128xf32> to vector<8x32xf32>
    %68 = vector.extract_strided_slice %66 {offsets = [0, 32], sizes = [8, 32], strides = [1, 1]} : vector<8x128xf32> to vector<8x32xf32>
    %69 = vector.extract_strided_slice %66 {offsets = [0, 64], sizes = [8, 32], strides = [1, 1]} : vector<8x128xf32> to vector<8x32xf32>
    %cst_25 = arith.constant 2.000000e+00 : f32
    %70 = vector.broadcast %cst_25 : f32 to vector<8x32xf32>
    %71 = arith.mulf %70, %69 : vector<8x32xf32>
    %cst_26 = arith.constant 1.000000e+00 : f32
    %72 = vector.broadcast %cst_26 : f32 to vector<8x32xf32>
    %73 = arith.subf %71, %72 : vector<8x32xf32>
    %74 = vector.extract_strided_slice %66 {offsets = [0, 96], sizes = [8, 32], strides = [1, 1]} : vector<8x128xf32> to vector<8x32xf32>
    %75 = arith.mulf %68, %33 : vector<8x32xf32>
    %76 = arith.mulf %67, %73 : vector<8x32xf32>
    %77 = arith.addf %75, %76 : vector<8x32xf32>
    %78 = math.tanh %77 : vector<8x32xf32>
    %79 = arith.mulf %74, %78 : vector<8x32xf32>
    %cst_27 = arith.constant dense<0.000000e+00> : vector<8x256xf32>
    %80 = tpu.matmul %79, %6, %cst_27 {dimension_numbers = #tpu.dot_dimension_numbers<[1], [0], [0], [1], [0, 0, 1, 1], [], []>} : vector<8x32xf32>, vector<32x256xf32>, vector<8x256xf32> -> vector<8x256xf32>
    %81 = vector.extract_strided_slice %80 {offsets = [0, 128], sizes = [8, 128], strides = [1, 1]} : vector<8x256xf32> to vector<8x128xf32>
    %82 = vector.extract_strided_slice %80 {offsets = [0, 0], sizes = [8, 128], strides = [1, 1]} : vector<8x256xf32> to vector<8x128xf32>
    %83 = arith.addf %82, %59 : vector<8x128xf32>
    %84 = arith.addf %83, %10 : vector<8x128xf32>
    %85 = arith.negf %84 : vector<8x128xf32>
    %86 = math.exp %85 : vector<8x128xf32>
    %cst_28 = arith.constant 1.000000e+00 : f32
    %87 = vector.broadcast %cst_28 : f32 to vector<8x128xf32>
    %88 = arith.addf %87, %86 : vector<8x128xf32>
    %89 = arith.divf %87, %88 : vector<8x128xf32>
    %90 = vector.extract_strided_slice %89 {offsets = [0, 0], sizes = [8, 32], strides = [1, 1]} : vector<8x128xf32> to vector<8x32xf32>
    %91 = vector.extract_strided_slice %89 {offsets = [0, 32], sizes = [8, 32], strides = [1, 1]} : vector<8x128xf32> to vector<8x32xf32>
    %92 = vector.extract_strided_slice %89 {offsets = [0, 64], sizes = [8, 32], strides = [1, 1]} : vector<8x128xf32> to vector<8x32xf32>
    %cst_29 = arith.constant 2.000000e+00 : f32
    %93 = vector.broadcast %cst_29 : f32 to vector<8x32xf32>
    %94 = arith.mulf %93, %92 : vector<8x32xf32>
    %cst_30 = arith.constant 1.000000e+00 : f32
    %95 = vector.broadcast %cst_30 : f32 to vector<8x32xf32>
    %96 = arith.subf %94, %95 : vector<8x32xf32>
    %97 = vector.extract_strided_slice %89 {offsets = [0, 96], sizes = [8, 32], strides = [1, 1]} : vector<8x128xf32> to vector<8x32xf32>
    %98 = arith.mulf %91, %56 : vector<8x32xf32>
    %99 = arith.mulf %90, %96 : vector<8x32xf32>
    %100 = arith.addf %98, %99 : vector<8x32xf32>
    %101 = math.tanh %100 : vector<8x32xf32>
    %102 = arith.mulf %97, %101 : vector<8x32xf32>
    %cst_31 = arith.constant dense<0.000000e+00> : vector<8x128xf32>
    %103 = tpu.matmul %102, %7, %cst_31 {dimension_numbers = #tpu.dot_dimension_numbers<[1], [0], [0], [1], [0, 0, 1, 1], [], []>} : vector<8x32xf32>, vector<32x128xf32>, vector<8x128xf32> -> vector<8x128xf32>
    %104 = vector.extract_strided_slice %5 {offsets = [16, 0], sizes = [8, 128], strides = [1, 1]} : vector<64x128xf32> to vector<8x128xf32>
    %105 = arith.addf %104, %81 : vector<8x128xf32>
    %106 = arith.negf %105 : vector<8x128xf32>
    %107 = math.exp %106 : vector<8x128xf32>
    %cst_32 = arith.constant 1.000000e+00 : f32
    %108 = vector.broadcast %cst_32 : f32 to vector<8x128xf32>
    %109 = arith.addf %108, %107 : vector<8x128xf32>
    %110 = arith.divf %108, %109 : vector<8x128xf32>
    %111 = vector.extract_strided_slice %110 {offsets = [0, 0], sizes = [8, 32], strides = [1, 1]} : vector<8x128xf32> to vector<8x32xf32>
    %112 = vector.extract_strided_slice %110 {offsets = [0, 32], sizes = [8, 32], strides = [1, 1]} : vector<8x128xf32> to vector<8x32xf32>
    %113 = vector.extract_strided_slice %110 {offsets = [0, 64], sizes = [8, 32], strides = [1, 1]} : vector<8x128xf32> to vector<8x32xf32>
    %cst_33 = arith.constant 2.000000e+00 : f32
    %114 = vector.broadcast %cst_33 : f32 to vector<8x32xf32>
    %115 = arith.mulf %114, %113 : vector<8x32xf32>
    %cst_34 = arith.constant 1.000000e+00 : f32
    %116 = vector.broadcast %cst_34 : f32 to vector<8x32xf32>
    %117 = arith.subf %115, %116 : vector<8x32xf32>
    %118 = vector.extract_strided_slice %110 {offsets = [0, 96], sizes = [8, 32], strides = [1, 1]} : vector<8x128xf32> to vector<8x32xf32>
    %119 = arith.mulf %112, %77 : vector<8x32xf32>
    %120 = arith.mulf %111, %117 : vector<8x32xf32>
    %121 = arith.addf %119, %120 : vector<8x32xf32>
    %122 = math.tanh %121 : vector<8x32xf32>
    %123 = arith.mulf %118, %122 : vector<8x32xf32>
    %cst_35 = arith.constant dense<0.000000e+00> : vector<8x256xf32>
    %124 = tpu.matmul %123, %6, %cst_35 {dimension_numbers = #tpu.dot_dimension_numbers<[1], [0], [0], [1], [0, 0, 1, 1], [], []>} : vector<8x32xf32>, vector<32x256xf32>, vector<8x256xf32> -> vector<8x256xf32>
    %125 = vector.extract_strided_slice %124 {offsets = [0, 128], sizes = [8, 128], strides = [1, 1]} : vector<8x256xf32> to vector<8x128xf32>
    %126 = vector.extract_strided_slice %124 {offsets = [0, 0], sizes = [8, 128], strides = [1, 1]} : vector<8x256xf32> to vector<8x128xf32>
    %127 = arith.addf %126, %103 : vector<8x128xf32>
    %128 = arith.addf %127, %10 : vector<8x128xf32>
    %129 = arith.negf %128 : vector<8x128xf32>
    %130 = math.exp %129 : vector<8x128xf32>
    %cst_36 = arith.constant 1.000000e+00 : f32
    %131 = vector.broadcast %cst_36 : f32 to vector<8x128xf32>
    %132 = arith.addf %131, %130 : vector<8x128xf32>
    %133 = arith.divf %131, %132 : vector<8x128xf32>
    %134 = vector.extract_strided_slice %133 {offsets = [0, 0], sizes = [8, 32], strides = [1, 1]} : vector<8x128xf32> to vector<8x32xf32>
    %135 = vector.extract_strided_slice %133 {offsets = [0, 32], sizes = [8, 32], strides = [1, 1]} : vector<8x128xf32> to vector<8x32xf32>
    %136 = vector.extract_strided_slice %133 {offsets = [0, 64], sizes = [8, 32], strides = [1, 1]} : vector<8x128xf32> to vector<8x32xf32>
    %cst_37 = arith.constant 2.000000e+00 : f32
    %137 = vector.broadcast %cst_37 : f32 to vector<8x32xf32>
    %138 = arith.mulf %137, %136 : vector<8x32xf32>
    %cst_38 = arith.constant 1.000000e+00 : f32
    %139 = vector.broadcast %cst_38 : f32 to vector<8x32xf32>
    %140 = arith.subf %138, %139 : vector<8x32xf32>
    %141 = vector.extract_strided_slice %133 {offsets = [0, 96], sizes = [8, 32], strides = [1, 1]} : vector<8x128xf32> to vector<8x32xf32>
    %142 = arith.mulf %135, %100 : vector<8x32xf32>
    %143 = arith.mulf %134, %140 : vector<8x32xf32>
    %144 = arith.addf %142, %143 : vector<8x32xf32>
    %145 = math.tanh %144 : vector<8x32xf32>
    %146 = arith.mulf %141, %145 : vector<8x32xf32>
    %cst_39 = arith.constant dense<0.000000e+00> : vector<8x128xf32>
    %147 = tpu.matmul %146, %7, %cst_39 {dimension_numbers = #tpu.dot_dimension_numbers<[1], [0], [0], [1], [0, 0, 1, 1], [], []>} : vector<8x32xf32>, vector<32x128xf32>, vector<8x128xf32> -> vector<8x128xf32>
    %148 = vector.extract_strided_slice %5 {offsets = [24, 0], sizes = [8, 128], strides = [1, 1]} : vector<64x128xf32> to vector<8x128xf32>
    %149 = arith.addf %148, %125 : vector<8x128xf32>
    %150 = arith.negf %149 : vector<8x128xf32>
    %151 = math.exp %150 : vector<8x128xf32>
    %cst_40 = arith.constant 1.000000e+00 : f32
    %152 = vector.broadcast %cst_40 : f32 to vector<8x128xf32>
    %153 = arith.addf %152, %151 : vector<8x128xf32>
    %154 = arith.divf %152, %153 : vector<8x128xf32>
    %155 = vector.extract_strided_slice %154 {offsets = [0, 0], sizes = [8, 32], strides = [1, 1]} : vector<8x128xf32> to vector<8x32xf32>
    %156 = vector.extract_strided_slice %154 {offsets = [0, 32], sizes = [8, 32], strides = [1, 1]} : vector<8x128xf32> to vector<8x32xf32>
    %157 = vector.extract_strided_slice %154 {offsets = [0, 64], sizes = [8, 32], strides = [1, 1]} : vector<8x128xf32> to vector<8x32xf32>
    %cst_41 = arith.constant 2.000000e+00 : f32
    %158 = vector.broadcast %cst_41 : f32 to vector<8x32xf32>
    %159 = arith.mulf %158, %157 : vector<8x32xf32>
    %cst_42 = arith.constant 1.000000e+00 : f32
    %160 = vector.broadcast %cst_42 : f32 to vector<8x32xf32>
    %161 = arith.subf %159, %160 : vector<8x32xf32>
    %162 = vector.extract_strided_slice %154 {offsets = [0, 96], sizes = [8, 32], strides = [1, 1]} : vector<8x128xf32> to vector<8x32xf32>
    %163 = arith.mulf %156, %121 : vector<8x32xf32>
    %164 = arith.mulf %155, %161 : vector<8x32xf32>
    %165 = arith.addf %163, %164 : vector<8x32xf32>
    %166 = math.tanh %165 : vector<8x32xf32>
    %167 = arith.mulf %162, %166 : vector<8x32xf32>
    %cst_43 = arith.constant dense<0.000000e+00> : vector<8x256xf32>
    %168 = tpu.matmul %167, %6, %cst_43 {dimension_numbers = #tpu.dot_dimension_numbers<[1], [0], [0], [1], [0, 0, 1, 1], [], []>} : vector<8x32xf32>, vector<32x256xf32>, vector<8x256xf32> -> vector<8x256xf32>
    %169 = vector.extract_strided_slice %168 {offsets = [0, 128], sizes = [8, 128], strides = [1, 1]} : vector<8x256xf32> to vector<8x128xf32>
    %170 = vector.extract_strided_slice %168 {offsets = [0, 0], sizes = [8, 128], strides = [1, 1]} : vector<8x256xf32> to vector<8x128xf32>
    %171 = arith.addf %170, %147 : vector<8x128xf32>
    %172 = arith.addf %171, %10 : vector<8x128xf32>
    %173 = arith.negf %172 : vector<8x128xf32>
    %174 = math.exp %173 : vector<8x128xf32>
    %cst_44 = arith.constant 1.000000e+00 : f32
    %175 = vector.broadcast %cst_44 : f32 to vector<8x128xf32>
    %176 = arith.addf %175, %174 : vector<8x128xf32>
    %177 = arith.divf %175, %176 : vector<8x128xf32>
    %178 = vector.extract_strided_slice %177 {offsets = [0, 0], sizes = [8, 32], strides = [1, 1]} : vector<8x128xf32> to vector<8x32xf32>
    %179 = vector.extract_strided_slice %177 {offsets = [0, 32], sizes = [8, 32], strides = [1, 1]} : vector<8x128xf32> to vector<8x32xf32>
    %180 = vector.extract_strided_slice %177 {offsets = [0, 64], sizes = [8, 32], strides = [1, 1]} : vector<8x128xf32> to vector<8x32xf32>
    %cst_45 = arith.constant 2.000000e+00 : f32
    %181 = vector.broadcast %cst_45 : f32 to vector<8x32xf32>
    %182 = arith.mulf %181, %180 : vector<8x32xf32>
    %cst_46 = arith.constant 1.000000e+00 : f32
    %183 = vector.broadcast %cst_46 : f32 to vector<8x32xf32>
    %184 = arith.subf %182, %183 : vector<8x32xf32>
    %185 = vector.extract_strided_slice %177 {offsets = [0, 96], sizes = [8, 32], strides = [1, 1]} : vector<8x128xf32> to vector<8x32xf32>
    %186 = arith.mulf %179, %144 : vector<8x32xf32>
    %187 = arith.mulf %178, %184 : vector<8x32xf32>
    %188 = arith.addf %186, %187 : vector<8x32xf32>
    %189 = math.tanh %188 : vector<8x32xf32>
    %190 = arith.mulf %185, %189 : vector<8x32xf32>
    %cst_47 = arith.constant dense<0.000000e+00> : vector<8x128xf32>
    %191 = tpu.matmul %190, %7, %cst_47 {dimension_numbers = #tpu.dot_dimension_numbers<[1], [0], [0], [1], [0, 0, 1, 1], [], []>} : vector<8x32xf32>, vector<32x128xf32>, vector<8x128xf32> -> vector<8x128xf32>
    %192 = vector.extract_strided_slice %5 {offsets = [32, 0], sizes = [8, 128], strides = [1, 1]} : vector<64x128xf32> to vector<8x128xf32>
    %193 = arith.addf %192, %169 : vector<8x128xf32>
    %194 = arith.negf %193 : vector<8x128xf32>
    %195 = math.exp %194 : vector<8x128xf32>
    %cst_48 = arith.constant 1.000000e+00 : f32
    %196 = vector.broadcast %cst_48 : f32 to vector<8x128xf32>
    %197 = arith.addf %196, %195 : vector<8x128xf32>
    %198 = arith.divf %196, %197 : vector<8x128xf32>
    %199 = vector.extract_strided_slice %198 {offsets = [0, 0], sizes = [8, 32], strides = [1, 1]} : vector<8x128xf32> to vector<8x32xf32>
    %200 = vector.extract_strided_slice %198 {offsets = [0, 32], sizes = [8, 32], strides = [1, 1]} : vector<8x128xf32> to vector<8x32xf32>
    %201 = vector.extract_strided_slice %198 {offsets = [0, 64], sizes = [8, 32], strides = [1, 1]} : vector<8x128xf32> to vector<8x32xf32>
    %cst_49 = arith.constant 2.000000e+00 : f32
    %202 = vector.broadcast %cst_49 : f32 to vector<8x32xf32>
    %203 = arith.mulf %202, %201 : vector<8x32xf32>
    %cst_50 = arith.constant 1.000000e+00 : f32
    %204 = vector.broadcast %cst_50 : f32 to vector<8x32xf32>
    %205 = arith.subf %203, %204 : vector<8x32xf32>
    %206 = vector.extract_strided_slice %198 {offsets = [0, 96], sizes = [8, 32], strides = [1, 1]} : vector<8x128xf32> to vector<8x32xf32>
    %207 = arith.mulf %200, %165 : vector<8x32xf32>
    %208 = arith.mulf %199, %205 : vector<8x32xf32>
    %209 = arith.addf %207, %208 : vector<8x32xf32>
    %210 = math.tanh %209 : vector<8x32xf32>
    %211 = arith.mulf %206, %210 : vector<8x32xf32>
    %cst_51 = arith.constant dense<0.000000e+00> : vector<8x256xf32>
    %212 = tpu.matmul %211, %6, %cst_51 {dimension_numbers = #tpu.dot_dimension_numbers<[1], [0], [0], [1], [0, 0, 1, 1], [], []>} : vector<8x32xf32>, vector<32x256xf32>, vector<8x256xf32> -> vector<8x256xf32>
    %213 = vector.extract_strided_slice %212 {offsets = [0, 128], sizes = [8, 128], strides = [1, 1]} : vector<8x256xf32> to vector<8x128xf32>
    %214 = vector.extract_strided_slice %212 {offsets = [0, 0], sizes = [8, 128], strides = [1, 1]} : vector<8x256xf32> to vector<8x128xf32>
    %215 = arith.addf %214, %191 : vector<8x128xf32>
    %216 = arith.addf %215, %10 : vector<8x128xf32>
    %217 = arith.negf %216 : vector<8x128xf32>
    %218 = math.exp %217 : vector<8x128xf32>
    %cst_52 = arith.constant 1.000000e+00 : f32
    %219 = vector.broadcast %cst_52 : f32 to vector<8x128xf32>
    %220 = arith.addf %219, %218 : vector<8x128xf32>
    %221 = arith.divf %219, %220 : vector<8x128xf32>
    %222 = vector.extract_strided_slice %221 {offsets = [0, 0], sizes = [8, 32], strides = [1, 1]} : vector<8x128xf32> to vector<8x32xf32>
    %223 = vector.extract_strided_slice %221 {offsets = [0, 32], sizes = [8, 32], strides = [1, 1]} : vector<8x128xf32> to vector<8x32xf32>
    %224 = vector.extract_strided_slice %221 {offsets = [0, 64], sizes = [8, 32], strides = [1, 1]} : vector<8x128xf32> to vector<8x32xf32>
    %cst_53 = arith.constant 2.000000e+00 : f32
    %225 = vector.broadcast %cst_53 : f32 to vector<8x32xf32>
    %226 = arith.mulf %225, %224 : vector<8x32xf32>
    %cst_54 = arith.constant 1.000000e+00 : f32
    %227 = vector.broadcast %cst_54 : f32 to vector<8x32xf32>
    %228 = arith.subf %226, %227 : vector<8x32xf32>
    %229 = vector.extract_strided_slice %221 {offsets = [0, 96], sizes = [8, 32], strides = [1, 1]} : vector<8x128xf32> to vector<8x32xf32>
    %230 = arith.mulf %223, %188 : vector<8x32xf32>
    %231 = arith.mulf %222, %228 : vector<8x32xf32>
    %232 = arith.addf %230, %231 : vector<8x32xf32>
    %233 = math.tanh %232 : vector<8x32xf32>
    %234 = arith.mulf %229, %233 : vector<8x32xf32>
    %cst_55 = arith.constant dense<0.000000e+00> : vector<8x128xf32>
    %235 = tpu.matmul %234, %7, %cst_55 {dimension_numbers = #tpu.dot_dimension_numbers<[1], [0], [0], [1], [0, 0, 1, 1], [], []>} : vector<8x32xf32>, vector<32x128xf32>, vector<8x128xf32> -> vector<8x128xf32>
    %236 = vector.extract_strided_slice %5 {offsets = [40, 0], sizes = [8, 128], strides = [1, 1]} : vector<64x128xf32> to vector<8x128xf32>
    %237 = arith.addf %236, %213 : vector<8x128xf32>
    %238 = arith.negf %237 : vector<8x128xf32>
    %239 = math.exp %238 : vector<8x128xf32>
    %cst_56 = arith.constant 1.000000e+00 : f32
    %240 = vector.broadcast %cst_56 : f32 to vector<8x128xf32>
    %241 = arith.addf %240, %239 : vector<8x128xf32>
    %242 = arith.divf %240, %241 : vector<8x128xf32>
    %243 = vector.extract_strided_slice %242 {offsets = [0, 0], sizes = [8, 32], strides = [1, 1]} : vector<8x128xf32> to vector<8x32xf32>
    %244 = vector.extract_strided_slice %242 {offsets = [0, 32], sizes = [8, 32], strides = [1, 1]} : vector<8x128xf32> to vector<8x32xf32>
    %245 = vector.extract_strided_slice %242 {offsets = [0, 64], sizes = [8, 32], strides = [1, 1]} : vector<8x128xf32> to vector<8x32xf32>
    %cst_57 = arith.constant 2.000000e+00 : f32
    %246 = vector.broadcast %cst_57 : f32 to vector<8x32xf32>
    %247 = arith.mulf %246, %245 : vector<8x32xf32>
    %cst_58 = arith.constant 1.000000e+00 : f32
    %248 = vector.broadcast %cst_58 : f32 to vector<8x32xf32>
    %249 = arith.subf %247, %248 : vector<8x32xf32>
    %250 = vector.extract_strided_slice %242 {offsets = [0, 96], sizes = [8, 32], strides = [1, 1]} : vector<8x128xf32> to vector<8x32xf32>
    %251 = arith.mulf %244, %209 : vector<8x32xf32>
    %252 = arith.mulf %243, %249 : vector<8x32xf32>
    %253 = arith.addf %251, %252 : vector<8x32xf32>
    %254 = math.tanh %253 : vector<8x32xf32>
    %255 = arith.mulf %250, %254 : vector<8x32xf32>
    %cst_59 = arith.constant dense<0.000000e+00> : vector<8x256xf32>
    %256 = tpu.matmul %255, %6, %cst_59 {dimension_numbers = #tpu.dot_dimension_numbers<[1], [0], [0], [1], [0, 0, 1, 1], [], []>} : vector<8x32xf32>, vector<32x256xf32>, vector<8x256xf32> -> vector<8x256xf32>
    %257 = vector.extract_strided_slice %256 {offsets = [0, 128], sizes = [8, 128], strides = [1, 1]} : vector<8x256xf32> to vector<8x128xf32>
    %258 = vector.extract_strided_slice %256 {offsets = [0, 0], sizes = [8, 128], strides = [1, 1]} : vector<8x256xf32> to vector<8x128xf32>
    %259 = arith.addf %258, %235 : vector<8x128xf32>
    %260 = arith.addf %259, %10 : vector<8x128xf32>
    %261 = arith.negf %260 : vector<8x128xf32>
    %262 = math.exp %261 : vector<8x128xf32>
    %cst_60 = arith.constant 1.000000e+00 : f32
    %263 = vector.broadcast %cst_60 : f32 to vector<8x128xf32>
    %264 = arith.addf %263, %262 : vector<8x128xf32>
    %265 = arith.divf %263, %264 : vector<8x128xf32>
    %266 = vector.extract_strided_slice %265 {offsets = [0, 0], sizes = [8, 32], strides = [1, 1]} : vector<8x128xf32> to vector<8x32xf32>
    %267 = vector.extract_strided_slice %265 {offsets = [0, 32], sizes = [8, 32], strides = [1, 1]} : vector<8x128xf32> to vector<8x32xf32>
    %268 = vector.extract_strided_slice %265 {offsets = [0, 64], sizes = [8, 32], strides = [1, 1]} : vector<8x128xf32> to vector<8x32xf32>
    %cst_61 = arith.constant 2.000000e+00 : f32
    %269 = vector.broadcast %cst_61 : f32 to vector<8x32xf32>
    %270 = arith.mulf %269, %268 : vector<8x32xf32>
    %cst_62 = arith.constant 1.000000e+00 : f32
    %271 = vector.broadcast %cst_62 : f32 to vector<8x32xf32>
    %272 = arith.subf %270, %271 : vector<8x32xf32>
    %273 = vector.extract_strided_slice %265 {offsets = [0, 96], sizes = [8, 32], strides = [1, 1]} : vector<8x128xf32> to vector<8x32xf32>
    %274 = arith.mulf %267, %232 : vector<8x32xf32>
    %275 = arith.mulf %266, %272 : vector<8x32xf32>
    %276 = arith.addf %274, %275 : vector<8x32xf32>
    %277 = math.tanh %276 : vector<8x32xf32>
    %278 = arith.mulf %273, %277 : vector<8x32xf32>
    %cst_63 = arith.constant dense<0.000000e+00> : vector<8x128xf32>
    %279 = tpu.matmul %278, %7, %cst_63 {dimension_numbers = #tpu.dot_dimension_numbers<[1], [0], [0], [1], [0, 0, 1, 1], [], []>} : vector<8x32xf32>, vector<32x128xf32>, vector<8x128xf32> -> vector<8x128xf32>
    %280 = vector.extract_strided_slice %5 {offsets = [48, 0], sizes = [8, 128], strides = [1, 1]} : vector<64x128xf32> to vector<8x128xf32>
    %281 = arith.addf %280, %257 : vector<8x128xf32>
    %282 = arith.negf %281 : vector<8x128xf32>
    %283 = math.exp %282 : vector<8x128xf32>
    %cst_64 = arith.constant 1.000000e+00 : f32
    %284 = vector.broadcast %cst_64 : f32 to vector<8x128xf32>
    %285 = arith.addf %284, %283 : vector<8x128xf32>
    %286 = arith.divf %284, %285 : vector<8x128xf32>
    %287 = vector.extract_strided_slice %286 {offsets = [0, 0], sizes = [8, 32], strides = [1, 1]} : vector<8x128xf32> to vector<8x32xf32>
    %288 = vector.extract_strided_slice %286 {offsets = [0, 32], sizes = [8, 32], strides = [1, 1]} : vector<8x128xf32> to vector<8x32xf32>
    %289 = vector.extract_strided_slice %286 {offsets = [0, 64], sizes = [8, 32], strides = [1, 1]} : vector<8x128xf32> to vector<8x32xf32>
    %cst_65 = arith.constant 2.000000e+00 : f32
    %290 = vector.broadcast %cst_65 : f32 to vector<8x32xf32>
    %291 = arith.mulf %290, %289 : vector<8x32xf32>
    %cst_66 = arith.constant 1.000000e+00 : f32
    %292 = vector.broadcast %cst_66 : f32 to vector<8x32xf32>
    %293 = arith.subf %291, %292 : vector<8x32xf32>
    %294 = vector.extract_strided_slice %286 {offsets = [0, 96], sizes = [8, 32], strides = [1, 1]} : vector<8x128xf32> to vector<8x32xf32>
    %295 = arith.mulf %288, %253 : vector<8x32xf32>
    %296 = arith.mulf %287, %293 : vector<8x32xf32>
    %297 = arith.addf %295, %296 : vector<8x32xf32>
    %298 = math.tanh %297 : vector<8x32xf32>
    %299 = arith.mulf %294, %298 : vector<8x32xf32>
    %cst_67 = arith.constant dense<0.000000e+00> : vector<8x256xf32>
    %300 = tpu.matmul %299, %6, %cst_67 {dimension_numbers = #tpu.dot_dimension_numbers<[1], [0], [0], [1], [0, 0, 1, 1], [], []>} : vector<8x32xf32>, vector<32x256xf32>, vector<8x256xf32> -> vector<8x256xf32>
    %301 = vector.extract_strided_slice %300 {offsets = [0, 128], sizes = [8, 128], strides = [1, 1]} : vector<8x256xf32> to vector<8x128xf32>
    %302 = vector.extract_strided_slice %300 {offsets = [0, 0], sizes = [8, 128], strides = [1, 1]} : vector<8x256xf32> to vector<8x128xf32>
    %303 = arith.addf %302, %279 : vector<8x128xf32>
    %304 = arith.addf %303, %10 : vector<8x128xf32>
    %305 = arith.negf %304 : vector<8x128xf32>
    %306 = math.exp %305 : vector<8x128xf32>
    %cst_68 = arith.constant 1.000000e+00 : f32
    %307 = vector.broadcast %cst_68 : f32 to vector<8x128xf32>
    %308 = arith.addf %307, %306 : vector<8x128xf32>
    %309 = arith.divf %307, %308 : vector<8x128xf32>
    %310 = vector.extract_strided_slice %309 {offsets = [0, 0], sizes = [8, 32], strides = [1, 1]} : vector<8x128xf32> to vector<8x32xf32>
    %311 = vector.extract_strided_slice %309 {offsets = [0, 32], sizes = [8, 32], strides = [1, 1]} : vector<8x128xf32> to vector<8x32xf32>
    %312 = vector.extract_strided_slice %309 {offsets = [0, 64], sizes = [8, 32], strides = [1, 1]} : vector<8x128xf32> to vector<8x32xf32>
    %cst_69 = arith.constant 2.000000e+00 : f32
    %313 = vector.broadcast %cst_69 : f32 to vector<8x32xf32>
    %314 = arith.mulf %313, %312 : vector<8x32xf32>
    %cst_70 = arith.constant 1.000000e+00 : f32
    %315 = vector.broadcast %cst_70 : f32 to vector<8x32xf32>
    %316 = arith.subf %314, %315 : vector<8x32xf32>
    %317 = vector.extract_strided_slice %309 {offsets = [0, 96], sizes = [8, 32], strides = [1, 1]} : vector<8x128xf32> to vector<8x32xf32>
    %318 = arith.mulf %311, %276 : vector<8x32xf32>
    %319 = arith.mulf %310, %316 : vector<8x32xf32>
    %320 = arith.addf %318, %319 : vector<8x32xf32>
    %321 = math.tanh %320 : vector<8x32xf32>
    %322 = arith.mulf %317, %321 : vector<8x32xf32>
    %cst_71 = arith.constant dense<0.000000e+00> : vector<8x128xf32>
    %323 = tpu.matmul %322, %7, %cst_71 {dimension_numbers = #tpu.dot_dimension_numbers<[1], [0], [0], [1], [0, 0, 1, 1], [], []>} : vector<8x32xf32>, vector<32x128xf32>, vector<8x128xf32> -> vector<8x128xf32>
    %324 = vector.extract_strided_slice %5 {offsets = [56, 0], sizes = [8, 128], strides = [1, 1]} : vector<64x128xf32> to vector<8x128xf32>
    %325 = arith.addf %324, %301 : vector<8x128xf32>
    %326 = arith.negf %325 : vector<8x128xf32>
    %327 = math.exp %326 : vector<8x128xf32>
    %cst_72 = arith.constant 1.000000e+00 : f32
    %328 = vector.broadcast %cst_72 : f32 to vector<8x128xf32>
    %329 = arith.addf %328, %327 : vector<8x128xf32>
    %330 = arith.divf %328, %329 : vector<8x128xf32>
    %331 = vector.extract_strided_slice %330 {offsets = [0, 0], sizes = [8, 32], strides = [1, 1]} : vector<8x128xf32> to vector<8x32xf32>
    %332 = vector.extract_strided_slice %330 {offsets = [0, 32], sizes = [8, 32], strides = [1, 1]} : vector<8x128xf32> to vector<8x32xf32>
    %333 = vector.extract_strided_slice %330 {offsets = [0, 64], sizes = [8, 32], strides = [1, 1]} : vector<8x128xf32> to vector<8x32xf32>
    %cst_73 = arith.constant 2.000000e+00 : f32
    %334 = vector.broadcast %cst_73 : f32 to vector<8x32xf32>
    %335 = arith.mulf %334, %333 : vector<8x32xf32>
    %cst_74 = arith.constant 1.000000e+00 : f32
    %336 = vector.broadcast %cst_74 : f32 to vector<8x32xf32>
    %337 = arith.subf %335, %336 : vector<8x32xf32>
    %338 = vector.extract_strided_slice %330 {offsets = [0, 96], sizes = [8, 32], strides = [1, 1]} : vector<8x128xf32> to vector<8x32xf32>
    %339 = arith.mulf %332, %297 : vector<8x32xf32>
    %340 = arith.mulf %331, %337 : vector<8x32xf32>
    %341 = arith.addf %339, %340 : vector<8x32xf32>
    %342 = math.tanh %341 : vector<8x32xf32>
    %343 = arith.mulf %338, %342 : vector<8x32xf32>
    %cst_75 = arith.constant dense<0.000000e+00> : vector<8x256xf32>
    %344 = tpu.matmul %343, %6, %cst_75 {dimension_numbers = #tpu.dot_dimension_numbers<[1], [0], [0], [1], [0, 0, 1, 1], [], []>} : vector<8x32xf32>, vector<32x256xf32>, vector<8x256xf32> -> vector<8x256xf32>
    %345 = vector.extract_strided_slice %344 {offsets = [0, 0], sizes = [8, 128], strides = [1, 1]} : vector<8x256xf32> to vector<8x128xf32>
    %346 = arith.addf %345, %323 : vector<8x128xf32>
    %347 = arith.addf %346, %10 : vector<8x128xf32>
    %348 = arith.negf %347 : vector<8x128xf32>
    %349 = math.exp %348 : vector<8x128xf32>
    %cst_76 = arith.constant 1.000000e+00 : f32
    %350 = vector.broadcast %cst_76 : f32 to vector<8x128xf32>
    %351 = arith.addf %350, %349 : vector<8x128xf32>
    %352 = arith.divf %350, %351 : vector<8x128xf32>
    %353 = vector.extract_strided_slice %352 {offsets = [0, 0], sizes = [8, 32], strides = [1, 1]} : vector<8x128xf32> to vector<8x32xf32>
    %354 = vector.extract_strided_slice %352 {offsets = [0, 32], sizes = [8, 32], strides = [1, 1]} : vector<8x128xf32> to vector<8x32xf32>
    %355 = vector.extract_strided_slice %352 {offsets = [0, 64], sizes = [8, 32], strides = [1, 1]} : vector<8x128xf32> to vector<8x32xf32>
    %cst_77 = arith.constant 2.000000e+00 : f32
    %356 = vector.broadcast %cst_77 : f32 to vector<8x32xf32>
    %357 = arith.mulf %356, %355 : vector<8x32xf32>
    %cst_78 = arith.constant 1.000000e+00 : f32
    %358 = vector.broadcast %cst_78 : f32 to vector<8x32xf32>
    %359 = arith.subf %357, %358 : vector<8x32xf32>
    %360 = vector.extract_strided_slice %352 {offsets = [0, 96], sizes = [8, 32], strides = [1, 1]} : vector<8x128xf32> to vector<8x32xf32>
    %361 = arith.mulf %354, %320 : vector<8x32xf32>
    %362 = arith.mulf %353, %359 : vector<8x32xf32>
    %363 = arith.addf %361, %362 : vector<8x32xf32>
    %364 = math.tanh %363 : vector<8x32xf32>
    %365 = arith.mulf %360, %364 : vector<8x32xf32>
    %cst_79 = arith.constant dense<0.000000e+00> : vector<8xf32>
    %366 = vector.multi_reduction <add>, %365, %cst_79 [1] : vector<8x32xf32> to vector<8xf32>
    %367 = vector.shape_cast %366 : vector<8xf32> to vector<8x1xf32>
    %cst_80 = arith.constant 3.200000e+01 : f32
    %368 = vector.broadcast %cst_80 : f32 to vector<8x1xf32>
    %369 = arith.divf %367, %368 : vector<8x1xf32>
    %370 = vector.broadcast %369 : vector<8x1xf32> to vector<8x32xf32>
    %371 = arith.subf %365, %370 : vector<8x32xf32>
    %372 = arith.mulf %371, %371 : vector<8x32xf32>
    %cst_81 = arith.constant dense<0.000000e+00> : vector<8xf32>
    %373 = vector.multi_reduction <add>, %372, %cst_81 [1] : vector<8x32xf32> to vector<8xf32>
    %374 = vector.shape_cast %373 : vector<8xf32> to vector<8x1xf32>
    %cst_82 = arith.constant 3.200000e+01 : f32
    %375 = vector.broadcast %cst_82 : f32 to vector<8x1xf32>
    %376 = arith.divf %374, %375 : vector<8x1xf32>
    %377 = vector.broadcast %369 : vector<8x1xf32> to vector<8x32xf32>
    %378 = arith.subf %365, %377 : vector<8x32xf32>
    %cst_83 = arith.constant 9.99999974E-6 : f32
    %379 = vector.broadcast %cst_83 : f32 to vector<8x1xf32>
    %380 = arith.addf %376, %379 : vector<8x1xf32>
    %381 = math.rsqrt %380 : vector<8x1xf32>
    %382 = vector.broadcast %381 : vector<8x1xf32> to vector<8x32xf32>
    %383 = arith.mulf %378, %382 : vector<8x32xf32>
    %c0_84 = arith.constant 0 : index
    %c0_85 = arith.constant 0 : index
    %384 = vector.load %arg6[%c0_84, %c0_85] : memref<1x32xf32, #tpu.memory_space<vmem>>, vector<1x32xf32>
    %385 = vector.broadcast %384 : vector<1x32xf32> to vector<8x32xf32>
    %386 = arith.mulf %383, %385 : vector<8x32xf32>
    %c0_86 = arith.constant 0 : index
    %c0_87 = arith.constant 0 : index
    %387 = vector.load %arg7[%c0_86, %c0_87] : memref<1x32xf32, #tpu.memory_space<vmem>>, vector<1x32xf32>
    %388 = vector.broadcast %387 : vector<1x32xf32> to vector<8x32xf32>
    %389 = arith.addf %386, %388 : vector<8x32xf32>
    %cst_88 = arith.constant 0.000000e+00 : f32
    %390 = vector.broadcast %cst_88 : f32 to vector<8x32xf32>
    %391 = arith.maximumf %389, %390 : vector<8x32xf32>
    %c0_89 = arith.constant 0 : index
    %c0_90 = arith.constant 0 : index
    %392 = vector.load %arg8[%c0_89, %c0_90] : memref<32x2xf32, #tpu.memory_space<vmem>>, vector<32x2xf32>
    %cst_91 = arith.constant dense<0.000000e+00> : vector<8x2xf32>
    %393 = tpu.matmul %391, %392, %cst_91 {dimension_numbers = #tpu.dot_dimension_numbers<[1], [0], [0], [1], [0, 0, 1, 1], [], []>} : vector<8x32xf32>, vector<32x2xf32>, vector<8x2xf32> -> vector<8x2xf32>
    %c0_92 = arith.constant 0 : index
    %c0_93 = arith.constant 0 : index
    %394 = vector.load %arg9[%c0_92, %c0_93] : memref<1x2xf32, #tpu.memory_space<vmem>>, vector<1x2xf32>
    %395 = vector.broadcast %394 : vector<1x2xf32> to vector<8x2xf32>
    %396 = arith.addf %393, %395 : vector<8x2xf32>
    %c0_94 = arith.constant 0 : index
    %c0_95 = arith.constant 0 : index
    %397 = vector.load %arg10[%c0_94, %c0_95] : memref<8x2xf32, #tpu.memory_space<vmem>>, vector<8x2xf32>
    tpu.vector_store %arg10[%c0_94, %c0_95], %396 {strides = array<i32>} : memref<8x2xf32, #tpu.memory_space<vmem>>, vector<8x2xf32>,
    return
  }
}

</mosaic_0001>

<bundles_post_ra>
// kernel: eye_state_double_lstm_32.1
= control target key start
LH: loop header
LB: loop body
LE: loop exit
PB: predicated region body
PF: predicated region fallthrough
CT: control target
= control target key end

     0   :  { %vm76_vm0 = vcmask 1043456   ;;  %vm51_vm1 = vcmask 31744   ;;  %v2422_v18 = vmov 0.0|0.0   ;;  %vm2423_vm2 = vmmov 0   ;;  %s2425_s16 = smov 96   ;;  %s2821_s1 = inlined_call_operand.vmem [shape: f32[4,128], index: 1, kind: input, shape index: {}]   ;;  %s2822_s0 = inlined_call_operand.vmem [shape: f32[64,4], index: 0, kind: input, shape index: {}]   ;;  %s2823_s2 = inlined_call_operand.vmem [shape: f32[1,128], index: 2, kind: input, shape index: {}]   ;;  %s2824_s4 = inlined_call_operand.vmem [shape: f32[32,128], index: 4, kind: input, shape index: {}]   ;;  %s2825_s3 = inlined_call_operand.vmem [shape: f32[32,256], index: 3, kind: input, shape index: {}]   ;;  %s2826_s5 = inlined_call_operand.vmem [shape: f32[1,128], index: 5, kind: input, shape index: {}]   ;;  %s2827_s6 = inlined_call_operand.vmem [shape: f32[1,32], index: 6, kind: input, shape index: {}]   ;;  %s2828_s7 = inlined_call_operand.vmem [shape: f32[1,32], index: 7, kind: input, shape index: {}]   ;;  %s2829_s8 = inlined_call_operand.vmem [shape: f32[32,2], index: 8, kind: input, shape index: {}]   ;;  %s2830_s9 = inlined_call_operand.vmem [shape: f32[1,2], index: 9, kind: input, shape index: {}]   ;;  %s2831_s10 = inlined_call_operand.vmem [shape: f32[8,2], index: 10, kind: output, shape index: {}]  }
   0x1   :  { %v43_v0 = vld [vmem:[%s2821_s1] sm:$0xf]  ;;  %v36_v2 = vld [vmem:[%s2822_s0 + $0x8] sm:$0xff]  ;;  %s2420_s1 = smov 64   ;;  %2198 = vmatprep.subr.bf16.mxu1 %v2422_v18  ;;  %v195_v21 = vld [vmem:[%s2824_s4 + $0x10] sm:$0xff]  ;;  %v2424_v22 = vmov 0.0  }
   0x2   :  { %v35_v1 = vld [vmem:[%s2822_s0] sm:$0xff]  ;;  %2085 = vmatprep.subr.msk.mxu0 %vm76_vm0, %v43_v0  ;;  %v194_v20 = vld [vmem:[%s2824_s4 + $0x8] sm:$0xff]  ;;  %2107 = vmatprep.mubr.msk.f32.mxu1 %vm2423_vm2, %v2424_v22  ;;  %v196_v24 = vld [vmem:[%s2824_s4 + $0x18] sm:$0xff]  ;;  %vm204_vm3 = vcmask 261120   ;;  %vm1963_vm4 = vcmask 15360  }
   0x3   :  { %2087 = vmatprep.mubr.msk.f32.mxu0 %vm51_vm1, %v35_v1  ;;  %2086 = vmatpush3.msk.msra.mxu0 %vm76_vm0, %v43_v0  ;;  %v2495_v3 = vld [vmem:[%s2823_s2] ss:$0 sm:$0xff]  ;;  %s2421_s2 = smov 32   ;;  %v186_v25 = vld [vmem:[%s2825_s3 + $0x8] sm:$0xff]  ;;  %v188_v26 = vld [vmem:[%s2825_s3 + $0x18] sm:$0xff]  ;;  %v2530_v27 = vpack.c.bf16 %v196_v24, %v195_v21 }
   0x4   :  { %2088 = vmatmul.mubr.msk.f32.vlgmr.msra.gmra.mrb[0].mxu0 %vm51_vm1, %v36_v2  ;;  %v193_v19 = vld [vmem:[%s2824_s4] sm:$0xff]  ;;  %2212 = vmatprep.subr.bf16.mxu0 %v2422_v18  ;;  %v2534_v28 = vpack.c.bf16 %v188_v26, %v186_v25  ;;  %v187_v30 = vld [vmem:[%s2825_s3 + $0x10] sm:$0xff]  ;;  %v190_v31 = vld [vmem:[%s2825_s3 + $0x28] sm:$0xff] }
   0x5   :  { %v2517_v23 = vpack.c.bf16 %v194_v20, %v193_v19  ;;  %v185_v29 = vld [vmem:[%s2825_s3] sm:$0xff]  ;;  %v192_v32 = vld [vmem:[%s2825_s3 + $0x38] sm:$0xff]  ;;  %v191_v36 = vld [vmem:[%s2825_s3 + $0x30] sm:$0xff] }
   0x6   :  { %v2550_v33 = vpack.c.bf16 %v187_v30, %v185_v29  ;;  %v2554_v34 = vpack.c.bf16 %v192_v32, %v190_v31  ;;  %v189_v35 = vld [vmem:[%s2825_s3 + $0x20] sm:$0xff] }
   0x7   :  { %2200 = vmatpush3.bf16.msra.mxu1 %v2517_v23  ;;  %2214 = vmatpush3.bf16.msra.mxu0 %v2517_v23  ;;  %v2566_v38 = vpack.c.bf16 %v191_v36, %v189_v35  ;;  %v2584_v45 = vld [vmem:[%s2826_s5] ss:$0 sm:$0xff] }
   0x8   :  { %2201 = vmatprep.subr.bf16.mxu1 %v2422_v18  ;;  %2215 = vmatprep.subr.bf16.mxu0 %v2422_v18 }
   0xb   :  { %2203 = vmatpush3.bf16.msra.mxu1 %v2530_v27  ;;  %2217 = vmatpush3.bf16.msra.mxu0 %v2530_v27 }
   0xc   :  { %2205 = vmatprep.subr.bf16.mxu1 %v2534_v28  ;;  %2226 = vmatprep.subr.bf16.mxu0 %v2422_v18 }
   0xe   :  { %2108 = vmatmul.mubr.f32.vlgmr.msra.gmra.mrb[0].mxu1 %v2424_v22 }
   0xf   :  { %2207 = vmatpush1.bf16.msra.mxu1 %v2550_v33  ;;  %373 = vmatprep.mubr.f32.mxu1 %v2424_v22 }
  0x10   :  { %2209 = vmatprep.subr.bf16.mxu1 %v2554_v34 }
  0x13   :  { %2211 = vmatpush1.bf16.msra.mxu1 %v2566_v38 }
  0x14   :  { %2219 = vmatprep.subr.bf16.mxu1 %v2534_v28 }
  0xd7   :  { %v2497_v4 = vpop.f32.mrb[0].mxu0 }
  0xd8   :  { %v146_v5 = vpop.f32.mrb[1].mxu0  ;;  %v152_v44 = vadd.f32 %v2497_v4, %v2495_v3 }
  0xd9   :  { %v147_v6 = vadd.f32 %v2495_v3, %v146_v5 }
  0xdb   :  { %v1980_v7 = vmul.f32 -1.442695, %v147_v6 }
  0xdd   :  { %2322 = vpow2.f32 %v1980_v7 }
  0xe1   :  { %v274_v41 = vpop.f32.mrb[0].mxu1 }
  0xe2   :  { %v2109_v42 = vpop.f32.mrb[1].mxu1 }
  0xe7   :  { %v2323_v8 = vpop.eup %2322 }
  0xe8   :  { %v282_v9 = vadd.f32 1.0, %v2323_v8 }
  0xea   :  { %2324 = vrcp.f32 %v282_v9 }
  0xf4   :  { %v2325_v10 = vpop.eup %2324 }
  0xf5   :  { %v285_v11 = vmul.f32 2.0, %v2325_v10  ;;  %v287_v15 = vmul.f32 0.0, %v2325_v10 }
  0xf7   :  { %v1981_v12 = vadd.f32 -1.0, %v285_v11  ;;  %v38_v11 = vld [vmem:[%s2822_s0 + $0x18] sm:$0xff] }
  0xf9   :  { %289 = vrot.lane.b32.xlu0 %v1981_v12, %s2420_s1  ;;  %v39_v12 = vld [vmem:[%s2822_s0 + $0x20] sm:$0xff] }
 0x16b   :  { %v290_v13 = vpop.permute.xlu0 %289 }
 0x16c   :  { %v292_v14 = vmul.f32 %v2325_v10, %v290_v13  ;;  %v40_v13 = vld [vmem:[%s2822_s0 + $0x28] sm:$0xff] }
 0x16e   :  { %294 = vrot.lane.b32.xlu0 %v292_v14, %s2421_s2  ;;  %v41_v14 = vld [vmem:[%s2822_s0 + $0x30] sm:$0xff] }
 0x1e0   :  { %v295_v16 = vpop.permute.xlu0 %294 }
 0x1e1   :  { %v2502_v17 = vadd.f32 %v295_v16, %v287_v15  ;;  %v42_v15 = vld [vmem:[%s2822_s0 + $0x38] sm:$0xff] }
 0x1e3   :  { %2326 = vtanh.f32 %v2502_v17 }
 0x1ed   :  { %v2327_v37 = vpop.eup %2326 }
 0x1ee   :  { %300 = vrot.lane.b32.xlu1 %v2327_v37, %s2420_s1 }
 0x260   :  { %v301_v39 = vpop.permute.xlu1 %300 }
 0x261   :  { %v303_v40 = vmul.f32 %v2325_v10, %v301_v39  ;;  %v37_v10 = vld [vmem:[%s2822_s0 + $0x10] sm:$0xff] }
 0x262   :  { %2090 = vmatprep.mubr.msk.f32.mxu0 %vm51_vm1, %v37_v10 }
 0x263   :  { %305 = vrot.lane.b32.xlu1 %v303_v40, %s2421_s2  ;;  %2091 = vmatmul.mubr.msk.f32.gmra.mrb[2].mxu0 %vm51_vm1, %v38_v11 }
 0x264   :  { %2093 = vmatprep.mubr.msk.f32.mxu0 %vm51_vm1, %v39_v12 }
 0x267   :  { %2094 = vmatmul.mubr.msk.f32.gmra.mrb[4].mxu0 %vm51_vm1, %v40_v13 }
 0x268   :  { %2096 = vmatprep.mubr.msk.f32.mxu0 %vm51_vm1, %v41_v14 }
 0x26b   :  { %2097 = vmatmul.mubr.msk.f32.gmra.mrb[6].mxu0 %vm51_vm1, %v42_v15 }
 0x26c   :  { %2118 = vmatprep.mubr.msk.f32.mxu0 %vm2423_vm2, %v2424_v22 }
 0x2d5   :  { %v306_v43 = vpop.permute.xlu1 %305 }
 0x2d6   :  { %1982 = vmatmul.mubr.msk.f32.vlgmr.msra.gmra.mrb[2].mxu1 %vm204_vm3, %v306_v43 }
 0x2d7   :  { %2221 = vmatpush1.bf16.msra.mxu1 %v2550_v33  ;;  %577 = vmatprep.mubr.f32.mxu1 %v2424_v22 }
 0x2d8   :  { %2223 = vmatprep.subr.bf16.mxu1 %v2554_v34 }
 0x2db   :  { %2225 = vmatpush1.bf16.msra.mxu1 %v2566_v38 }
 0x2dc   :  { %2233 = vmatprep.subr.bf16.mxu1 %v2534_v28 }
 0x336   :  { %v2628_v25 = vpop.f32.mrb[2].mxu0 }
 0x337   :  { %v156_v26 = vpop.f32.mrb[3].mxu0  ;;  %v162_v14 = vadd.f32 %v2628_v25, %v2495_v3 }
 0x338   :  { %v157_v37 = vadd.f32 %v2495_v3, %v156_v26 }
 0x33a   :  { %v2630_v29 = vpop.f32.mrb[4].mxu0 }
 0x33b   :  { %v2632_v30 = vpop.f32.mrb[5].mxu0 }
 0x33e   :  { %v2634_v31 = vpop.f32.mrb[6].mxu0 }
 0x33f   :  { %v2636_v32 = vpop.f32.mrb[7].mxu0 }
 0x3a9   :  { %v375_v46 = vpop.f32.mrb[2].mxu1 }
 0x3aa   :  { %v380_v47 = vadd.f32 %v375_v46, %v274_v41  ;;  %v377_v48 = vpop.f32.mrb[3].mxu1 }
 0x3ab   :  { %v482_v49 = vadd.f32 %v377_v48, %v152_v44 }
 0x3ac   :  { %v381_v50 = vadd.f32 %v2584_v45, %v380_v47 }
 0x3ad   :  { %v1986_v51 = vmul.f32 -1.442695, %v482_v49 }
 0x3ae   :  { %v1983_v52 = vmul.f32 -1.442695, %v381_v50 }
 0x3af   :  { %2328 = vpow2.f32 %v1986_v51 }
 0x3b0   :  { %2330 = vpow2.f32 %v1983_v52 }
 0x3b9   :  { %v2329_v53 = vpop.eup %2328 }
 0x3ba   :  { %v2331_v54 = vpop.eup %2330  ;;  %v486_v55 = vadd.f32 1.0, %v2329_v53 }
 0x3bb   :  { %v385_v56 = vadd.f32 1.0, %v2331_v54 }
 0x3bc   :  { %2332 = vrcp.f32 %v486_v55 }
 0x3bd   :  { %2334 = vrcp.f32 %v385_v56 }
 0x3c6   :  { %v2333_v57 = vpop.eup %2332 }
 0x3c7   :  { %v2335_v58 = vpop.eup %2334  ;;  %v489_v59 = vmul.f32 2.0, %v2333_v57  ;;  %v491_v4 = vmul.f32 %v2333_v57, %v2502_v17 }
 0x3c8   :  { %v388_v60 = vmul.f32 2.0, %v2335_v58  ;;  %v390_v6 = vmul.f32 0.0, %v2335_v58 }
 0x3c9   :  { %v1987_v61 = vadd.f32 -1.0, %v489_v59 }
 0x3ca   :  { %v1984_v62 = vadd.f32 -1.0, %v388_v60 }
 0x3cb   :  { %493 = vrot.lane.b32.xlu1 %v1987_v61, %s2420_s1 }
 0x3cc   :  { %392 = vrot.lane.b32.xlu0 %v1984_v62, %s2420_s1 }
 0x43d   :  { %v494_v63 = vpop.permute.xlu1 %493 }
 0x43e   :  { %v496_v0 = vmul.f32 %v2333_v57, %v494_v63  ;;  %v393_v1 = vpop.permute.xlu0 %392 }
 0x43f   :  { %v395_v2 = vmul.f32 %v2335_v58, %v393_v1 }
 0x440   :  { %498 = vrot.lane.b32.xlu1 %v496_v0, %s2421_s2 }
 0x441   :  { %397 = vrot.lane.b32.xlu0 %v395_v2, %s2421_s2 }
 0x4b2   :  { %v499_v5 = vpop.permute.xlu1 %498 }
 0x4b3   :  { %v2592_v7 = vadd.f32 %v499_v5, %v491_v4  ;;  %v398_v8 = vpop.permute.xlu0 %397 }
 0x4b4   :  { %v2594_v9 = vadd.f32 %v398_v8, %v390_v6 }
 0x4b5   :  { %2336 = vtanh.f32 %v2592_v7 }
 0x4b6   :  { %2338 = vtanh.f32 %v2594_v9 }
 0x4bf   :  { %v2337_v16 = vpop.eup %2336 }
 0x4c0   :  { %v2339_v17 = vpop.eup %2338  ;;  %504 = vrot.lane.b32.xlu1 %v2337_v16, %s2420_s1 }
 0x4c1   :  { %403 = vrot.lane.b32.xlu0 %v2339_v17, %s2420_s1 }
 0x532   :  { %v505_v19 = vpop.permute.xlu1 %504 }
 0x533   :  { %v507_v20 = vmul.f32 %v2333_v57, %v505_v19  ;;  %v404_v21 = vpop.permute.xlu0 %403 }
 0x534   :  { %v406_v24 = vmul.f32 %v2335_v58, %v404_v21 }
 0x535   :  { %509 = vrot.lane.b32.xlu1 %v507_v20, %s2421_s2 }
 0x536   :  { %408 = vrot.lane.b32.xlu0 %v406_v24, %s2421_s2 }
 0x5a7   :  { %v510_v35 = vpop.permute.xlu1 %509 }
 0x5a8   :  { %v409_v36 = vpop.permute.xlu0 %408  ;;  %1988 = vmatmul.mubr.msk.f32.vlgmr.msra.gmra.mrb[4].mxu1 %vm204_vm3, %v510_v35 }
 0x5a9   :  { %2119 = vmatmul.mubr.msk.f32.vlgmr.msra.gmra.mrb[8].mxu0 %vm204_vm3, %v409_v36  ;;  %2235 = vmatpush1.bf16.msra.mxu1 %v2550_v33 }
 0x5aa   :  { %2228 = vmatpush3.bf16.msra.mxu0 %v2517_v23  ;;  %2237 = vmatprep.subr.bf16.mxu1 %v2554_v34 }
 0x5ab   :  { %2229 = vmatprep.subr.bf16.mxu0 %v2422_v18  ;;  %781 = vmatprep.mubr.f32.mxu1 %v2424_v22 }
 0x5ac   :  { %2129 = vmatprep.mubr.msk.f32.mxu0 %vm2423_vm2, %v2424_v22 }
 0x5ad   :  { %2239 = vmatpush1.bf16.msra.mxu1 %v2566_v38 }
 0x5ae   :  { %2231 = vmatpush3.bf16.msra.mxu0 %v2530_v27  ;;  %2247 = vmatprep.subr.bf16.mxu1 %v2534_v28 }
 0x5af   :  { %2240 = vmatprep.subr.bf16.mxu0 %v2422_v18 }
 0x67b   :  { %v579_v39 = vpop.f32.mrb[4].mxu1 }
 0x67c   :  { %v478_v40 = vpop.f32.mrb[8].mxu0  ;;  %v581_v41 = vpop.f32.mrb[5].mxu1 }
 0x67d   :  { %v584_v42 = vadd.f32 %v579_v39, %v478_v40  ;;  %v686_v43 = vadd.f32 %v581_v41, %v157_v37  ;;  %v2120_v44 = vpop.f32.mrb[9].mxu0 }
 0x67f   :  { %v585_v46 = vadd.f32 %v2584_v45, %v584_v42  ;;  %v1992_v47 = vmul.f32 -1.442695, %v686_v43 }
 0x681   :  { %v1989_v48 = vmul.f32 -1.442695, %v585_v46  ;;  %2340 = vpow2.f32 %v1992_v47 }
 0x683   :  { %2342 = vpow2.f32 %v1989_v48 }
 0x68b   :  { %v2341_v49 = vpop.eup %2340 }
 0x68c   :  { %v690_v50 = vadd.f32 1.0, %v2341_v49 }
 0x68d   :  { %v2343_v51 = vpop.eup %2342 }
 0x68e   :  { %v589_v52 = vadd.f32 1.0, %v2343_v51  ;;  %2344 = vrcp.f32 %v690_v50 }
 0x690   :  { %2346 = vrcp.f32 %v589_v52 }
 0x698   :  { %v2345_v53 = vpop.eup %2344 }
 0x699   :  { %v693_v54 = vmul.f32 2.0, %v2345_v53  ;;  %v695_v63 = vmul.f32 %v2345_v53, %v2592_v7 }
 0x69a   :  { %v2347_v55 = vpop.eup %2346 }
 0x69b   :  { %v1993_v56 = vadd.f32 -1.0, %v693_v54  ;;  %v592_v57 = vmul.f32 2.0, %v2347_v55  ;;  %v594_v2 = vmul.f32 %v2347_v55, %v2594_v9 }
 0x69d   :  { %697 = vrot.lane.b32.xlu1 %v1993_v56, %s2420_s1  ;;  %v1990_v58 = vadd.f32 -1.0, %v592_v57 }
 0x69f   :  { %596 = vrot.lane.b32.xlu0 %v1990_v58, %s2420_s1 }
 0x70f   :  { %v698_v59 = vpop.permute.xlu1 %697 }
 0x710   :  { %v700_v60 = vmul.f32 %v2345_v53, %v698_v59 }
 0x711   :  { %v597_v61 = vpop.permute.xlu0 %596 }
 0x712   :  { %v599_v62 = vmul.f32 %v2347_v55, %v597_v61  ;;  %702 = vrot.lane.b32.xlu1 %v700_v60, %s2421_s2 }
 0x714   :  { %601 = vrot.lane.b32.xlu0 %v599_v62, %s2421_s2 }
 0x784   :  { %v703_v0 = vpop.permute.xlu1 %702 }
 0x785   :  { %v705_v1 = vadd.f32 %v703_v0, %v695_v63 }
 0x786   :  { %v602_v4 = vpop.permute.xlu0 %601 }
 0x787   :  { %2348 = vtanh.f32 %v705_v1  ;;  %v604_v5 = vadd.f32 %v602_v4, %v594_v2 }
 0x789   :  { %2350 = vtanh.f32 %v604_v5 }
 0x791   :  { %v2349_v6 = vpop.eup %2348 }
 0x792   :  { %708 = vrot.lane.b32.xlu1 %v2349_v6, %s2420_s1 }
 0x793   :  { %v2351_v8 = vpop.eup %2350 }
 0x794   :  { %607 = vrot.lane.b32.xlu0 %v2351_v8, %s2420_s1 }
 0x804   :  { %v709_v10 = vpop.permute.xlu1 %708 }
 0x805   :  { %v711_v11 = vmul.f32 %v2345_v53, %v709_v10 }
 0x806   :  { %v608_v12 = vpop.permute.xlu0 %607 }
 0x807   :  { %v610_v13 = vmul.f32 %v2347_v55, %v608_v12  ;;  %713 = vrot.lane.b32.xlu1 %v711_v11, %s2421_s2 }
 0x809   :  { %612 = vrot.lane.b32.xlu0 %v610_v13, %s2421_s2 }
 0x879   :  { %v714_v7 = vpop.permute.xlu1 %713 }
 0x87a   :  { %1994 = vmatmul.mubr.msk.f32.vlgmr.msra.gmra.mrb[6].mxu1 %vm204_vm3, %v714_v7 }
 0x87b   :  { %v613_v9 = vpop.permute.xlu0 %612  ;;  %2249 = vmatpush1.bf16.msra.mxu1 %v2550_v33  ;;  %985 = vmatprep.mubr.f32.mxu1 %v2424_v22 }
 0x87c   :  { %2130 = vmatmul.mubr.msk.f32.vlgmr.msra.gmra.mrb[10].mxu0 %vm204_vm3, %v613_v9  ;;  %2251 = vmatprep.subr.bf16.mxu1 %v2554_v34 }
 0x87d   :  { %2242 = vmatpush3.bf16.msra.mxu0 %v2517_v23  ;;  %2140 = vmatprep.mubr.msk.f32.mxu0 %vm2423_vm2, %v2424_v22 }
 0x87e   :  { %2243 = vmatprep.subr.bf16.mxu0 %v2422_v18 }
 0x87f   :  { %2253 = vmatpush1.bf16.msra.mxu1 %v2566_v38 }
 0x880   :  { %2261 = vmatprep.subr.bf16.mxu1 %v2534_v28 }
 0x881   :  { %2245 = vmatpush3.bf16.msra.mxu0 %v2530_v27 }
 0x882   :  { %2254 = vmatprep.subr.bf16.mxu0 %v2422_v18 }
 0x94d   :  { %v783_v15 = vpop.f32.mrb[6].mxu1 }
 0x94e   :  { %v785_v16 = vpop.f32.mrb[7].mxu1 }
 0x94f   :  { %v890_v17 = vadd.f32 %v785_v16, %v162_v14  ;;  %v682_v19 = vpop.f32.mrb[10].mxu0 }
 0x950   :  { %v788_v20 = vadd.f32 %v783_v15, %v682_v19  ;;  %v2131_v21 = vpop.f32.mrb[11].mxu0 }
 0x951   :  { %v1998_v24 = vmul.f32 -1.442695, %v890_v17 }
 0x952   :  { %v789_v26 = vadd.f32 %v2584_v45, %v788_v20 }
 0x953   :  { %2352 = vpow2.f32 %v1998_v24 }
 0x954   :  { %v1995_v35 = vmul.f32 -1.442695, %v789_v26 }
 0x956   :  { %2354 = vpow2.f32 %v1995_v35 }
 0x95d   :  { %v2353_v36 = vpop.eup %2352 }
 0x95e   :  { %v894_v37 = vadd.f32 1.0, %v2353_v36 }
 0x960   :  { %v2355_v39 = vpop.eup %2354  ;;  %2356 = vrcp.f32 %v894_v37 }
 0x961   :  { %v793_v40 = vadd.f32 1.0, %v2355_v39 }
 0x963   :  { %2358 = vrcp.f32 %v793_v40 }
 0x96a   :  { %v2357_v41 = vpop.eup %2356 }
 0x96b   :  { %v897_v25 = vmul.f32 2.0, %v2357_v41  ;;  %v899_v51 = vmul.f32 %v2357_v41, %v705_v1  ;;  %v167_v1 = vadd.f32 %v2495_v3, %v2632_v30 }
 0x96d   :  { %v2359_v42 = vpop.eup %2358  ;;  %v1999_v43 = vadd.f32 -1.0, %v897_v25 }
 0x96e   :  { %v796_v44 = vmul.f32 2.0, %v2359_v42  ;;  %v798_v54 = vmul.f32 %v2359_v42, %v604_v5 }
 0x96f   :  { %901 = vrot.lane.b32.xlu1 %v1999_v43, %s2420_s1 }
 0x970   :  { %v1996_v46 = vadd.f32 -1.0, %v796_v44 }
 0x972   :  { %800 = vrot.lane.b32.xlu0 %v1996_v46, %s2420_s1 }
 0x9e1   :  { %v902_v47 = vpop.permute.xlu1 %901 }
 0x9e2   :  { %v904_v48 = vmul.f32 %v2357_v41, %v902_v47 }
 0x9e4   :  { %v801_v49 = vpop.permute.xlu0 %800  ;;  %906 = vrot.lane.b32.xlu1 %v904_v48, %s2421_s2 }
 0x9e5   :  { %v803_v50 = vmul.f32 %v2359_v42, %v801_v49 }
 0x9e7   :  { %805 = vrot.lane.b32.xlu0 %v803_v50, %s2421_s2 }
 0xa56   :  { %v907_v52 = vpop.permute.xlu1 %906 }
 0xa57   :  { %v909_v53 = vadd.f32 %v907_v52, %v899_v51  ;;  %v172_v52 = vadd.f32 %v2630_v29, %v2495_v3 }
 0xa59   :  { %2360 = vtanh.f32 %v909_v53  ;;  %v806_v55 = vpop.permute.xlu0 %805 }
 0xa5a   :  { %v808_v56 = vadd.f32 %v806_v55, %v798_v54 }
 0xa5c   :  { %2362 = vtanh.f32 %v808_v56 }
 0xa63   :  { %v2361_v57 = vpop.eup %2360 }
 0xa64   :  { %912 = vrot.lane.b32.xlu1 %v2361_v57, %s2420_s1 }
 0xa66   :  { %v2363_v58 = vpop.eup %2362 }
 0xa67   :  { %811 = vrot.lane.b32.xlu0 %v2363_v58, %s2420_s1 }
 0xad6   :  { %v913_v59 = vpop.permute.xlu1 %912 }
 0xad7   :  { %v915_v60 = vmul.f32 %v2357_v41, %v913_v59 }
 0xad9   :  { %v812_v61 = vpop.permute.xlu0 %811  ;;  %917 = vrot.lane.b32.xlu1 %v915_v60, %s2421_s2 }
 0xada   :  { %v814_v62 = vmul.f32 %v2359_v42, %v812_v61 }
 0xadc   :  { %816 = vrot.lane.b32.xlu0 %v814_v62, %s2421_s2 }
 0xb4b   :  { %v918_v63 = vpop.permute.xlu1 %917 }
 0xb4c   :  { %2000 = vmatmul.mubr.msk.f32.vlgmr.msra.gmra.mrb[8].mxu1 %vm204_vm3, %v918_v63 }
 0xb4d   :  { %2263 = vmatpush1.bf16.msra.mxu1 %v2550_v33  ;;  %1189 = vmatprep.mubr.f32.mxu1 %v2424_v22 }
 0xb4e   :  { %v817_v0 = vpop.permute.xlu0 %816  ;;  %2265 = vmatprep.subr.bf16.mxu1 %v2554_v34 }
 0xb4f   :  { %2141 = vmatmul.mubr.msk.f32.vlgmr.msra.gmra.mrb[12].mxu0 %vm204_vm3, %v817_v0 }
 0xb50   :  { %2256 = vmatpush3.bf16.msra.mxu0 %v2517_v23  ;;  %2151 = vmatprep.mubr.msk.f32.mxu0 %vm2423_vm2, %v2424_v22 }
 0xb51   :  { %2267 = vmatpush1.bf16.msra.mxu1 %v2566_v38  ;;  %2257 = vmatprep.subr.bf16.mxu0 %v2422_v18 }
 0xb52   :  { %2275 = vmatprep.subr.bf16.mxu1 %v2534_v28 }
 0xb54   :  { %2259 = vmatpush3.bf16.msra.mxu0 %v2530_v27 }
 0xb55   :  { %2268 = vmatprep.subr.bf16.mxu0 %v2422_v18 }
 0xc1f   :  { %v987_v2 = vpop.f32.mrb[8].mxu1 }
 0xc20   :  { %v989_v4 = vpop.f32.mrb[9].mxu1 }
 0xc21   :  { %v1094_v5 = vadd.f32 %v989_v4, %v167_v1 }
 0xc22   :  { %v886_v6 = vpop.f32.mrb[12].mxu0 }
 0xc23   :  { %v2004_v8 = vmul.f32 -1.442695, %v1094_v5  ;;  %v992_v10 = vadd.f32 %v987_v2, %v886_v6  ;;  %v2142_v11 = vpop.f32.mrb[13].mxu0 }
 0xc25   :  { %2364 = vpow2.f32 %v2004_v8  ;;  %v993_v12 = vadd.f32 %v2584_v45, %v992_v10 }
 0xc27   :  { %v2001_v13 = vmul.f32 -1.442695, %v993_v12 }
 0xc29   :  { %2366 = vpow2.f32 %v2001_v13 }
 0xc2f   :  { %v2365_v7 = vpop.eup %2364 }
 0xc30   :  { %v1098_v9 = vadd.f32 1.0, %v2365_v7 }
 0xc32   :  { %2368 = vrcp.f32 %v1098_v9 }
 0xc33   :  { %v2367_v14 = vpop.eup %2366 }
 0xc34   :  { %v997_v15 = vadd.f32 1.0, %v2367_v14 }
 0xc36   :  { %2370 = vrcp.f32 %v997_v15 }
 0xc3c   :  { %v2369_v16 = vpop.eup %2368 }
 0xc3d   :  { %v1101_v30 = vmul.f32 2.0, %v2369_v16  ;;  %v1103_v37 = vmul.f32 %v2369_v16, %v909_v53 }
 0xc3f   :  { %v2005_v17 = vadd.f32 -1.0, %v1101_v30 }
 0xc40   :  { %v2371_v19 = vpop.eup %2370 }
 0xc41   :  { %1105 = vrot.lane.b32.xlu1 %v2005_v17, %s2420_s1  ;;  %v1000_v20 = vmul.f32 2.0, %v2371_v19  ;;  %v1002_v41 = vmul.f32 %v2371_v19, %v808_v56 }
 0xc43   :  { %v2002_v21 = vadd.f32 -1.0, %v1000_v20 }
 0xc45   :  { %1004 = vrot.lane.b32.xlu0 %v2002_v21, %s2420_s1 }
 0xcb3   :  { %v1106_v24 = vpop.permute.xlu1 %1105 }
 0xcb4   :  { %v1108_v26 = vmul.f32 %v2369_v16, %v1106_v24 }
 0xcb6   :  { %1110 = vrot.lane.b32.xlu1 %v1108_v26, %s2421_s2 }
 0xcb7   :  { %v1005_v35 = vpop.permute.xlu0 %1004 }
 0xcb8   :  { %v1007_v36 = vmul.f32 %v2371_v19, %v1005_v35 }
 0xcba   :  { %1009 = vrot.lane.b32.xlu0 %v1007_v36, %s2421_s2 }
 0xd28   :  { %v1111_v39 = vpop.permute.xlu1 %1110 }
 0xd29   :  { %v1113_v40 = vadd.f32 %v1111_v39, %v1103_v37  ;;  %v177_v37 = vadd.f32 %v2495_v3, %v2636_v32 }
 0xd2b   :  { %2372 = vtanh.f32 %v1113_v40 }
 0xd2c   :  { %v1010_v25 = vpop.permute.xlu0 %1009 }
 0xd2d   :  { %v1012_v42 = vadd.f32 %v1010_v25, %v1002_v41 }
 0xd2f   :  { %2374 = vtanh.f32 %v1012_v42 }
 0xd35   :  { %v2373_v43 = vpop.eup %2372 }
 0xd36   :  { %1116 = vrot.lane.b32.xlu1 %v2373_v43, %s2420_s1 }
 0xd39   :  { %v2375_v44 = vpop.eup %2374 }
 0xd3a   :  { %1015 = vrot.lane.b32.xlu0 %v2375_v44, %s2420_s1 }
 0xda8   :  { %v1117_v46 = vpop.permute.xlu1 %1116 }
 0xda9   :  { %v1119_v47 = vmul.f32 %v2369_v16, %v1117_v46 }
 0xdab   :  { %1121 = vrot.lane.b32.xlu1 %v1119_v47, %s2421_s2 }
 0xdac   :  { %v1016_v48 = vpop.permute.xlu0 %1015 }
 0xdad   :  { %v1018_v49 = vmul.f32 %v2371_v19, %v1016_v48 }
 0xdaf   :  { %1020 = vrot.lane.b32.xlu0 %v1018_v49, %s2421_s2 }
 0xe1d   :  { %v1122_v50 = vpop.permute.xlu1 %1121 }
 0xe1e   :  { %2006 = vmatmul.mubr.msk.f32.vlgmr.msra.gmra.mrb[10].mxu1 %vm204_vm3, %v1122_v50 }
 0xe1f   :  { %2277 = vmatpush1.bf16.msra.mxu1 %v2550_v33  ;;  %1393 = vmatprep.mubr.f32.mxu1 %v2424_v22 }
 0xe20   :  { %2279 = vmatprep.subr.bf16.mxu1 %v2554_v34 }
 0xe21   :  { %v1021_v51 = vpop.permute.xlu0 %1020 }
 0xe22   :  { %2152 = vmatmul.mubr.msk.f32.vlgmr.msra.gmra.mrb[14].mxu0 %vm204_vm3, %v1021_v51 }
 0xe23   :  { %2281 = vmatpush1.bf16.msra.mxu1 %v2566_v38  ;;  %2270 = vmatpush3.bf16.msra.mxu0 %v2517_v23 }
 0xe24   :  { %2271 = vmatprep.subr.bf16.mxu0 %v2422_v18  ;;  %2162 = vmatprep.mubr.msk.f32.mxu0 %vm2423_vm2, %v2424_v22 }
 0xe25   :  { %2289 = vmatprep.subr.bf16.mxu1 %v2534_v28 }
 0xe27   :  { %2273 = vmatpush3.bf16.msra.mxu0 %v2530_v27 }
 0xe28   :  { %2282 = vmatprep.subr.bf16.mxu0 %v2422_v18 }
 0xef1   :  { %v1191_v53 = vpop.f32.mrb[10].mxu1 }
 0xef2   :  { %v1193_v54 = vpop.f32.mrb[11].mxu1 }
 0xef3   :  { %v1298_v55 = vadd.f32 %v1193_v54, %v172_v52 }
 0xef5   :  { %v2010_v56 = vmul.f32 -1.442695, %v1298_v55  ;;  %v1090_v57 = vpop.f32.mrb[14].mxu0 }
 0xef6   :  { %v1196_v58 = vadd.f32 %v1191_v53, %v1090_v57  ;;  %v2153_v59 = vpop.f32.mrb[15].mxu0 }
 0xef7   :  { %2376 = vpow2.f32 %v2010_v56 }
 0xef8   :  { %v1197_v60 = vadd.f32 %v2584_v45, %v1196_v58 }
 0xefa   :  { %v2007_v61 = vmul.f32 -1.442695, %v1197_v60 }
 0xefc   :  { %2378 = vpow2.f32 %v2007_v61 }
 0xf01   :  { %v2377_v62 = vpop.eup %2376 }
 0xf02   :  { %v1302_v63 = vadd.f32 1.0, %v2377_v62 }
 0xf04   :  { %2380 = vrcp.f32 %v1302_v63 }
 0xf06   :  { %v2379_v0 = vpop.eup %2378 }
 0xf07   :  { %v1201_v1 = vadd.f32 1.0, %v2379_v0 }
 0xf09   :  { %2382 = vrcp.f32 %v1201_v1 }
 0xf0e   :  { %v2381_v2 = vpop.eup %2380 }
 0xf0f   :  { %v1305_v29 = vmul.f32 2.0, %v2381_v2  ;;  %v1307_v7 = vmul.f32 %v2381_v2, %v1113_v40 }
 0xf11   :  { %v2011_v4 = vadd.f32 -1.0, %v1305_v29 }
 0xf13   :  { %v2383_v5 = vpop.eup %2382  ;;  %1309 = vrot.lane.b32.xlu1 %v2011_v4, %s2420_s1 }
 0xf14   :  { %v1204_v6 = vmul.f32 2.0, %v2383_v5  ;;  %v1206_v15 = vmul.f32 %v2383_v5, %v1012_v42 }
 0xf16   :  { %v2008_v8 = vadd.f32 -1.0, %v1204_v6 }
 0xf18   :  { %1208 = vrot.lane.b32.xlu0 %v2008_v8, %s2420_s1 }
 0xf85   :  { %v1310_v10 = vpop.permute.xlu1 %1309 }
 0xf86   :  { %v1312_v11 = vmul.f32 %v2381_v2, %v1310_v10 }
 0xf88   :  { %1314 = vrot.lane.b32.xlu1 %v1312_v11, %s2421_s2 }
 0xf8a   :  { %v1209_v12 = vpop.permute.xlu0 %1208 }
 0xf8b   :  { %v1211_v13 = vmul.f32 %v2383_v5, %v1209_v12 }
 0xf8d   :  { %1213 = vrot.lane.b32.xlu0 %v1211_v13, %s2421_s2 }
 0xffa   :  { %v1315_v9 = vpop.permute.xlu1 %1314 }
 0xffb   :  { %v1317_v14 = vadd.f32 %v1315_v9, %v1307_v7 }
 0xffd   :  { %2384 = vtanh.f32 %v1317_v14 }
 0xfff   :  { %v1214_v16 = vpop.permute.xlu0 %1213 }
0x1000   :  { %v1216_v30 = vadd.f32 %v1214_v16, %v1206_v15 }
0x1002   :  { %2386 = vtanh.f32 %v1216_v30 }
0x1007   :  { %v2385_v17 = vpop.eup %2384 }
0x1008   :  { %1320 = vrot.lane.b32.xlu1 %v2385_v17, %s2420_s1 }
0x100c   :  { %v2387_v19 = vpop.eup %2386 }
0x100d   :  { %1219 = vrot.lane.b32.xlu0 %v2387_v19, %s2420_s1 }
0x107a   :  { %v1321_v20 = vpop.permute.xlu1 %1320 }
0x107b   :  { %v1323_v21 = vmul.f32 %v2381_v2, %v1321_v20 }
0x107d   :  { %1325 = vrot.lane.b32.xlu1 %v1323_v21, %s2421_s2 }
0x107f   :  { %v1220_v24 = vpop.permute.xlu0 %1219 }
0x1080   :  { %v1222_v26 = vmul.f32 %v2383_v5, %v1220_v24 }
0x1082   :  { %1224 = vrot.lane.b32.xlu0 %v1222_v26, %s2421_s2 }
0x10ef   :  { %v1326_v35 = vpop.permute.xlu1 %1325 }
0x10f0   :  { %2012 = vmatmul.mubr.msk.f32.vlgmr.msra.gmra.mrb[12].mxu1 %vm204_vm3, %v1326_v35 }
0x10f1   :  { %2291 = vmatpush1.bf16.msra.mxu1 %v2550_v33  ;;  %1597 = vmatprep.mubr.f32.mxu1 %v2424_v22 }
0x10f2   :  { %2293 = vmatprep.subr.bf16.mxu1 %v2554_v34 }
0x10f4   :  { %v1225_v36 = vpop.permute.xlu0 %1224 }
0x10f5   :  { %2163 = vmatmul.mubr.msk.f32.vlgmr.msra.gmra.mrb[16].mxu0 %vm204_vm3, %v1225_v36  ;;  %2295 = vmatpush1.bf16.msra.mxu1 %v2566_v38 }
0x10f6   :  { %2284 = vmatpush3.bf16.msra.mxu0 %v2517_v23  ;;  %2173 = vmatprep.mubr.msk.f32.mxu0 %vm2423_vm2, %v2424_v22 }
0x10f7   :  { %2285 = vmatprep.subr.bf16.mxu0 %v2422_v18  ;;  %2303 = vmatprep.subr.bf16.mxu1 %v2534_v28 }
0x10fa   :  { %2287 = vmatpush3.bf16.msra.mxu0 %v2530_v27 }
0x10fb   :  { %2296 = vmatprep.subr.bf16.mxu0 %v2422_v18 }
0x11c3   :  { %v1395_v39 = vpop.f32.mrb[12].mxu1 }
0x11c4   :  { %v1397_v40 = vpop.f32.mrb[13].mxu1 }
0x11c5   :  { %v1502_v41 = vadd.f32 %v1397_v40, %v177_v37 }
0x11c7   :  { %v2016_v25 = vmul.f32 -1.442695, %v1502_v41 }
0x11c8   :  { %v1294_v42 = vpop.f32.mrb[16].mxu0 }
0x11c9   :  { %2388 = vpow2.f32 %v2016_v25  ;;  %v1400_v43 = vadd.f32 %v1395_v39, %v1294_v42  ;;  %v2164_v44 = vpop.f32.mrb[17].mxu0 }
0x11cb   :  { %v1401_v46 = vadd.f32 %v2584_v45, %v1400_v43 }
0x11cd   :  { %v2013_v47 = vmul.f32 -1.442695, %v1401_v46 }
0x11cf   :  { %2390 = vpow2.f32 %v2013_v47 }
0x11d3   :  { %v2389_v28 = vpop.eup %2388 }
0x11d4   :  { %v1506_v48 = vadd.f32 1.0, %v2389_v28 }
0x11d6   :  { %2392 = vrcp.f32 %v1506_v48 }
0x11d9   :  { %v2391_v49 = vpop.eup %2390 }
0x11da   :  { %v1405_v50 = vadd.f32 1.0, %v2391_v49 }
0x11dc   :  { %2394 = vrcp.f32 %v1405_v50 }
0x11e0   :  { %v2393_v51 = vpop.eup %2392 }
0x11e1   :  { %v1509_v32 = vmul.f32 2.0, %v2393_v51  ;;  %v1511_v60 = vmul.f32 %v2393_v51, %v1317_v14 }
0x11e3   :  { %v2017_v52 = vadd.f32 -1.0, %v1509_v32 }
0x11e5   :  { %1513 = vrot.lane.b32.xlu1 %v2017_v52, %s2420_s1 }
0x11e6   :  { %v2395_v53 = vpop.eup %2394 }
0x11e7   :  { %v1408_v54 = vmul.f32 2.0, %v2395_v53  ;;  %v1410_v63 = vmul.f32 %v2395_v53, %v1216_v30 }
0x11e9   :  { %v2014_v55 = vadd.f32 -1.0, %v1408_v54 }
0x11eb   :  { %1412 = vrot.lane.b32.xlu0 %v2014_v55, %s2420_s1 }
0x1257   :  { %v1514_v56 = vpop.permute.xlu1 %1513 }
0x1258   :  { %v1516_v57 = vmul.f32 %v2393_v51, %v1514_v56 }
0x125a   :  { %1518 = vrot.lane.b32.xlu1 %v1516_v57, %s2421_s2 }
0x125d   :  { %v1413_v58 = vpop.permute.xlu0 %1412 }
0x125e   :  { %v1415_v59 = vmul.f32 %v2395_v53, %v1413_v58 }
0x1260   :  { %1417 = vrot.lane.b32.xlu0 %v1415_v59, %s2421_s2 }
0x12cc   :  { %v1519_v61 = vpop.permute.xlu1 %1518 }
0x12cd   :  { %v1521_v62 = vadd.f32 %v1519_v61, %v1511_v60 }
0x12cf   :  { %2396 = vtanh.f32 %v1521_v62 }
0x12d2   :  { %v1418_v0 = vpop.permute.xlu0 %1417 }
0x12d3   :  { %v1420_v1 = vadd.f32 %v1418_v0, %v1410_v63 }
0x12d5   :  { %2398 = vtanh.f32 %v1420_v1 }
0x12d9   :  { %v2397_v2 = vpop.eup %2396 }
0x12da   :  { %1524 = vrot.lane.b32.xlu1 %v2397_v2, %s2420_s1 }
0x12df   :  { %v2399_v29 = vpop.eup %2398 }
0x12e0   :  { %1423 = vrot.lane.b32.xlu0 %v2399_v29, %s2420_s1 }
0x134c   :  { %v1525_v4 = vpop.permute.xlu1 %1524 }
0x134d   :  { %v1527_v5 = vmul.f32 %v2393_v51, %v1525_v4 }
0x134f   :  { %1529 = vrot.lane.b32.xlu1 %v1527_v5, %s2421_s2 }
0x1352   :  { %v1424_v6 = vpop.permute.xlu0 %1423 }
0x1353   :  { %v1426_v8 = vmul.f32 %v2395_v53, %v1424_v6 }
0x1355   :  { %1428 = vrot.lane.b32.xlu0 %v1426_v8, %s2421_s2  ;;  %v2027_v8 = vld [vmem:[%s2827_s6] ss:$0 sm:$0xff] }
0x13c1   :  { %v1530_v10 = vpop.permute.xlu1 %1529 }
0x13c2   :  { %2018 = vmatmul.mubr.msk.f32.vlgmr.msra.gmra.mrb[14].mxu1 %vm204_vm3, %v1530_v10 }
0x13c3   :  { %2305 = vmatpush1.bf16.msra.mxu1 %v2550_v33  ;;  %1801 = vmatprep.mubr.f32.mxu1 %v2424_v22  ;;  %v182_v33 = vadd.f32 %v2634_v31, %v2495_v3 }
0x13c4   :  { %2307 = vmatprep.subr.bf16.mxu1 %v2554_v34 }
0x13c7   :  { %v1429_v11 = vpop.permute.xlu0 %1428  ;;  %2309 = vmatpush1.bf16.msra.mxu1 %v2566_v38 }
0x13c8   :  { %2174 = vmatmul.mubr.msk.f32.vlgmr.msra.gmra.mrb[18].mxu0 %vm204_vm3, %v1429_v11 }
0x13c9   :  { %2298 = vmatpush3.bf16.msra.mxu0 %v2517_v23  ;;  %2184 = vmatprep.mubr.msk.f32.mxu0 %vm2423_vm2, %v2424_v22 }
0x13ca   :  { %2299 = vmatprep.subr.bf16.mxu0 %v2422_v18 }
0x13cd   :  { %2301 = vmatpush3.bf16.msra.mxu0 %v2530_v27 }
0x13ce   :  { %2310 = vmatprep.subr.bf16.mxu0 %v2422_v18 }
0x1495   :  { %v1599_v34 = vpop.f32.mrb[14].mxu1 }
0x1496   :  { %v1601_v12 = vpop.f32.mrb[15].mxu1 }
0x1497   :  { %v1706_v13 = vadd.f32 %v1601_v12, %v182_v33 }
0x1499   :  { %v2022_v38 = vmul.f32 -1.442695, %v1706_v13 }
0x149b   :  { %2400 = vpow2.f32 %v2022_v38  ;;  %v1498_v7 = vpop.f32.mrb[18].mxu0  ;;  %v2028_v38 = vld [vmem:[%s2828_s7] ss:$0 sm:$0xff] }
0x149c   :  { %v1604_v9 = vadd.f32 %v1599_v34, %v1498_v7  ;;  %v2175_v23 = vpop.f32.mrb[19].mxu0  ;;  %v1877_v7 = vld [vmem:[%s2829_s8] sm:$0xff] }
0x149d   :  { %v1879_v23 = vld [vmem:[%s2829_s8 + $0x10] sm:$0xff] }
0x149e   :  { %v1605_v14 = vadd.f32 %v2584_v45, %v1604_v9  ;;  %v1878_v9 = vld [vmem:[%s2829_s8 + $0x8] sm:$0xff] }
0x14a0   :  { %v2019_v15 = vmul.f32 -1.442695, %v1605_v14  ;;  %v2311_v14 = vpack.c.bf16 %v1878_v9, %v1877_v7 }
0x14a2   :  { %2402 = vpow2.f32 %v2019_v15  ;;  %v1880_v15 = vld [vmem:[%s2829_s8 + $0x18] sm:$0xff] }
0x14a5   :  { %v2401_v16 = vpop.eup %2400 }
0x14a6   :  { %v1710_v30 = vadd.f32 1.0, %v2401_v16  ;;  %v2314_v16 = vpack.c.bf16 %v1880_v15, %v1879_v23 }
0x14a8   :  { %2404 = vrcp.f32 %v1710_v30 }
0x14ac   :  { %v2403_v27 = vpop.eup %2402 }
0x14ad   :  { %v1609_v17 = vadd.f32 1.0, %v2403_v27 }
0x14af   :  { %2406 = vrcp.f32 %v1609_v17 }
0x14b2   :  { %v2405_v19 = vpop.eup %2404 }
0x14b3   :  { %v1713_v3 = vmul.f32 2.0, %v2405_v19  ;;  %v1715_v39 = vmul.f32 %v2405_v19, %v1521_v62 }
0x14b5   :  { %v2023_v31 = vadd.f32 -1.0, %v1713_v3 }
0x14b7   :  { %1717 = vrot.lane.b32.xlu1 %v2023_v31, %s2420_s1 }
0x14b9   :  { %v2407_v20 = vpop.eup %2406 }
0x14ba   :  { %v1612_v21 = vmul.f32 2.0, %v2407_v20  ;;  %v1614_v25 = vmul.f32 %v2407_v20, %v1420_v1 }
0x14bc   :  { %v2020_v24 = vadd.f32 -1.0, %v1612_v21 }
0x14be   :  { %1616 = vrot.lane.b32.xlu0 %v2020_v24, %s2420_s1 }
0x1529   :  { %v1718_v26 = vpop.permute.xlu1 %1717 }
0x152a   :  { %v1720_v35 = vmul.f32 %v2405_v19, %v1718_v26 }
0x152c   :  { %1722 = vrot.lane.b32.xlu1 %v1720_v35, %s2421_s2 }
0x1530   :  { %v1617_v36 = vpop.permute.xlu0 %1616 }
0x1531   :  { %v1619_v37 = vmul.f32 %v2407_v20, %v1617_v36 }
0x1533   :  { %1621 = vrot.lane.b32.xlu0 %v1619_v37, %s2421_s2 }
0x159e   :  { %v1723_v40 = vpop.permute.xlu1 %1722 }
0x159f   :  { %v1725_v41 = vadd.f32 %v1723_v40, %v1715_v39 }
0x15a1   :  { %2408 = vtanh.f32 %v1725_v41 }
0x15a5   :  { %v1622_v42 = vpop.permute.xlu0 %1621 }
0x15a6   :  { %v1624_v43 = vadd.f32 %v1622_v42, %v1614_v25 }
0x15a8   :  { %2410 = vtanh.f32 %v1624_v43 }
0x15ab   :  { %v2409_v44 = vpop.eup %2408 }
0x15ac   :  { %1728 = vrot.lane.b32.xlu1 %v2409_v44, %s2420_s1 }
0x15b2   :  { %v2411_v46 = vpop.eup %2410 }
0x15b3   :  { %1627 = vrot.lane.b32.xlu0 %v2411_v46, %s2420_s1 }
0x161e   :  { %v1729_v47 = vpop.permute.xlu1 %1728 }
0x161f   :  { %v1731_v28 = vmul.f32 %v2405_v19, %v1729_v47 }
0x1621   :  { %1733 = vrot.lane.b32.xlu1 %v1731_v28, %s2421_s2 }
0x1625   :  { %v1628_v48 = vpop.permute.xlu0 %1627 }
0x1626   :  { %v1630_v49 = vmul.f32 %v2407_v20, %v1628_v48 }
0x1628   :  { %1632 = vrot.lane.b32.xlu0 %v1630_v49, %s2421_s2 }
0x1693   :  { %v1734_v50 = vpop.permute.xlu1 %1733 }
0x1694   :  { %2024 = vmatmul.mubr.msk.f32.vlgmr.msra.gmra.mrb[16].mxu1 %vm204_vm3, %v1734_v50 }
0x169a   :  { %v1633_v51 = vpop.permute.xlu0 %1632 }
0x169b   :  { %2185 = vmatmul.mubr.msk.f32.vlgmr.msra.gmra.mrb[20].mxu0 %vm204_vm3, %v1633_v51 }
0x169c   :  { %2195 = vmatprep.mubr.msk.f32.mxu0 %vm2423_vm2, %v2424_v22  ;;  %2312 = vmatpush3.bf16.msra.mxu0 %v2311_v14 }
0x169d   :  { %2313 = vmatprep.subr.bf16.mxu0 %v2422_v18  ;;  %v2029_v18 = vld [vmem:[%s2830_s9] ss:$0 sm:$0xff] }
0x16a0   :  { %2315 = vmatpush3.bf16.msra.mxu0 %v2314_v16 }
0x1767   :  { %v1803_v32 = vpop.f32.mrb[16].mxu1 }
0x1768   :  { %v1805_v52 = vpop.f32.mrb[17].mxu1 }
0x176e   :  { %v1702_v53 = vpop.f32.mrb[20].mxu0 }
0x176f   :  { %v1807_v54 = vadd.f32 %v1803_v32, %v1702_v53  ;;  %v2186_v55 = vpop.f32.mrb[21].mxu0 }
0x1771   :  { %v1808_v56 = vadd.f32 %v2584_v45, %v1807_v54 }
0x1773   :  { %v2025_v57 = vmul.f32 -1.442695, %v1808_v56 }
0x1775   :  { %2412 = vpow2.f32 %v2025_v57 }
0x177f   :  { %v2413_v58 = vpop.eup %2412 }
0x1780   :  { %v1812_v59 = vadd.f32 1.0, %v2413_v58 }
0x1782   :  { %2414 = vrcp.f32 %v1812_v59 }
0x178c   :  { %v2415_v60 = vpop.eup %2414 }
0x178d   :  { %v1815_v61 = vmul.f32 2.0, %v2415_v60  ;;  %v1817_v22 = vmul.f32 %v2415_v60, %v1624_v43 }
0x178f   :  { %v2026_v62 = vadd.f32 -1.0, %v1815_v61 }
0x1791   :  { %1819 = vrot.lane.b32.xlu0 %v2026_v62, %s2420_s1 }
0x1803   :  { %v1820_v63 = vpop.permute.xlu0 %1819 }
0x1804   :  { %v1822_v0 = vmul.f32 %v2415_v60, %v1820_v63 }
0x1806   :  { %1824 = vrot.lane.b32.xlu1 %v1822_v0, %s2421_s2 }
0x1878   :  { %v1825_v1 = vpop.permute.xlu1 %1824 }
0x1879   :  { %v1827_v2 = vadd.f32 %v1825_v1, %v1817_v22 }
0x187b   :  { %2416 = vtanh.f32 %v1827_v2 }
0x1885   :  { %v2417_v29 = vpop.eup %2416 }
0x1886   :  { %1830 = vrot.lane.b32.xlu0 %v2417_v29, %s2420_s1 }
0x18f8   :  { %v1831_v45 = vpop.permute.xlu0 %1830 }
0x18f9   :  { %v1833_v4 = vmul.f32 %v2415_v60, %v1831_v45 }
0x18fb   :  { %1835 = vrot.lane.b32.xlu1 %v1833_v4, %s2421_s2 }
0x196d   :  { %v1836_v5 = vpop.permute.xlu1 %1835 }
0x196e   :  { %v1838_v6 = vsel %vm204_vm3, %v1836_v5, 0.0 }
0x196f   :  { %1839 = vadd.xlane.f32.xlu0 %v1838_v6 }
0x1985   :  { %1862 = vrot.lane.b32.xlu0 %v2027_v8, %s2425_s16 }
0x19fc   :  { %v1840_v10 = vpop.xlane.xlu0 %1839 }
0x19fd   :  { %v1842_v11 = vmul.f32 0.03125, %v1840_v10 }
0x19ff   :  { %v1843_v33 = vsub.f32 %v1833_v4, %v1842_v11 }
0x1a00   :  { %v1863_v3 = vpop.permute.xlu0 %1862 }
0x1a01   :  { %v1844_v34 = vmul.f32 %v1843_v33, %v1843_v33 }
0x1a03   :  { %1846 = vrot.lane.b32.xlu1 %v1844_v34, %s2421_s2 }
0x1a75   :  { %v1847_v12 = vpop.permute.xlu1 %1846 }
0x1a76   :  { %v1849_v13 = vsel %vm204_vm3, %v1847_v12, 0.0 }
0x1a77   :  { %1850 = vadd.xlane.f32.xlu1 %v1849_v13 }
0x1a88   :  { %1872 = vrot.lane.b32.xlu1 %v2028_v38, %s2425_s16 }
0x1b04   :  { %v1851_v30 = vpop.xlane.xlu1 %1850 }
0x1b05   :  { %v1852_v27 = vmul.f32 0.03125, %v1851_v30 }
0x1b07   :  { %v1853_v17 = vadd.f32 1e-05, %v1852_v27 }
0x1b08   :  { %v1873_v20 = vpop.permute.xlu1 %1872 }
0x1b09   :  { %2418 = vrsqrt.f32 %v1853_v17 }
0x1b13   :  { %v2419_v19 = vpop.eup %2418 }
0x1b14   :  { %v1855_v31 = vmul.f32 %v2419_v19, %v1843_v33 }
0x1b16   :  { %v1865_v21 = vmul.f32 %v1863_v3, %v1855_v31 }
0x1b18   :  { %v1875_v24 = vadd.f32 %v1873_v20, %v1865_v21 }
0x1b1a   :  { %v1876_v26 = vmax.f32 %v1875_v24, 0.0 }
0x1b1c   :  { %1889 = vrot.lane.b32.xlu0 %v1876_v26, %s2421_s2 }
0x1b8e   :  { %v1890_v35 = vpop.permute.xlu0 %1889 }
0x1b8f   :  { %2196 = vmatmul.mubr.msk.f32.vlgmr.msra.gmra.mrb[22].mxu0 %vm204_vm3, %v1890_v35 }
0x1c62   :  { %v1959_v36 = vpop.f32.mrb[22].mxu0 }
0x1c63   :  { %v1960_v37 = vadd.f32 %v2029_v18, %v1959_v36  ;;  %v2197_v39 = vpop.f32.mrb[23].mxu0 }
0x1c65   :  { %1964 = vst.msk [vmem:[%s2831_s10] sm:$0xff] %vm1963_vm4, %v1960_v37 }

</bundles_post_ra>
